<compile_context>
chip_gen: v7x
topology: tpu7x:2x2x1
jax: 0.10.0
libtpu: 0.0.40
codegen_flags: <defaults>
</compile_context>

<pallas_src>
import math
from functools import partial

import jax
import jax.numpy as jnp
from jax.experimental import pallas as pl
from jax.experimental.pallas import tpu as pltpu

LANE = 128           # TPU lane width; every feature dim is zero-padded to this
SLOT = 2 * LANE      # 256-wide weight slots so fused MXU-native matmuls fit


def _round_up(n, m):
    return ((n + m - 1) // m) * m


def _elu(y):
    # TODO(synk): jnp.expm1 would be marginally more accurate near 0; exp-1 is
    # kept (activations are f32) because exp has a guaranteed Mosaic lowering.
    return jnp.where(y > 0.0, y, jnp.exp(jnp.minimum(y, 0.0)) - 1.0)


# ------------------------------- fused kernel -------------------------------

def _fused_npe_kernel(theta_ref, x_ref, w_ref, b_ref, o_ref, *,
                      emb_layout, maf_layout, D):
    """Whole NPEWithEmbedding forward pass in one kernel.

    w_ref: (N, 256, 256) stacked zero-padded bf16 weights (VMEM-resident)
    b_ref: (N, 1, 256)   stacked zero-padded f32 biases
    Static Python loops unroll at trace time; all layer indices are static.
    """
    f32 = jnp.float32
    mxu = w_ref.dtype  # bf16 matmul inputs, f32 accumulation

    def lin(h, idx, act):
        w = w_ref[idx, :LANE, :LANE]
        y = jnp.dot(h.astype(mxu), w, preferred_element_type=f32)
        y = y + b_ref[idx][:, :LANE]
        return _elu(y) if act else y

    # ---- embedding: lampe.nn.ResMLP (proj + Residual(MLP)) per stage ------
    h = x_ref[...]                                   # (Bt, 128), real width 2*num_obs
    for proj_idx, block_idxs in emb_layout:
        if proj_idx is not None:
            h = lin(h, proj_idx, False)
        r = h
        n = len(block_idxs)
        for li, idx in enumerate(block_idxs):
            r = lin(r, idx, li < n - 1)
        h = h + r                                    # residual add, in-kernel
    ctx = h.astype(mxu)                              # (Bt, 128), cast to bf16 once

    # ---- MAF: per transform, MADE conditioner + affine AR -----------------
    z = theta_ref[...]                               # (Bt, 128), real width D, f32
    ladj = jnp.zeros(z.shape, f32)                   # lane-wise log|det| accumulator
    for (i_l1, i_l2, i_hd) in maf_layout:
        # fused first MADE layer: [z | ctx] (Bt,256) @ (256,128); concat is
        # lane-128-aligned so it is a pure layout op, masking is baked into W.
        zc = jnp.concatenate([z.astype(mxu), ctx], axis=-1)
        h1 = jnp.dot(zc, w_ref[i_l1, :, :LANE],
                     preferred_element_type=f32) + b_ref[i_l1][:, :LANE]
        h1 = _elu(h1)
        h2 = lin(h1, i_l2, True)
        # fused shift / log-scale heads: (Bt,128) @ (128,256), split at lane 128
        p = jnp.dot(h2.astype(mxu), w_ref[i_hd, :LANE, :],
                    preferred_element_type=f32) + b_ref[i_hd]
        shift, log_s = p[:, :LANE], p[:, LANE:]
        # TODO(synk): zuko's MonotonicAffineTransform uses a different soft-clip
        # parameterization; a tanh clamp to (-3, 3) is used instead.
        log_s = 3.0 * jnp.tanh(log_s * (1.0 / 3.0))
        z = z * jnp.exp(log_s) + shift               # pad lanes stay exactly 0
        ladj = ladj + log_s                          # VPU add, no XLU reduce

    # ---- standard-normal base log-prob + sum log|det| (single reduce) ------
    const = 0.5 * D * math.log(2.0 * math.pi)
    lp = jnp.sum(ladj - 0.5 * z * z, axis=-1, keepdims=True) - const
    # Lane-dense output: broadcast the (Bt,1) result across all 128 lanes so
    # the store is an unmasked full-vreg vst; the wrapper reads lane 0.
    o_ref[...] = jnp.broadcast_to(lp, o_ref.shape)


def npe_with_embedding_forward(theta, x, W, Bv, emb_layout, maf_layout, D,
                               block_b=128):
    B = theta.shape[0]
    Bt = int(min(block_b, _round_up(B, 8)))          # sublane-aligned batch tile
    Bp = _round_up(B, Bt)

    # Lane-pad to 128 and (if needed) row-pad the batch to a tile multiple.
    theta_p = jnp.zeros((Bp, LANE), jnp.float32).at[:B, :theta.shape[1]].set(theta)
    x_p = jnp.zeros((Bp, LANE), jnp.float32).at[:B, :x.shape[1]].set(x)

    n_emb = sum((1 if p is not None else 0) + len(b) for p, b in emb_layout)
    n_maf = len(maf_layout)
    flops = 2 * Bp * (LANE * LANE * (n_emb + n_maf) + 2 * n_maf * SLOT * LANE)
    transcendentals = Bp * LANE * (n_emb + 3 * n_maf)
    bytes_accessed = (W.size * W.dtype.itemsize + Bv.size * Bv.dtype.itemsize
                      + (theta_p.size + x_p.size + Bp * LANE) * 4)

    out = pl.pallas_call(
        partial(_fused_npe_kernel, emb_layout=emb_layout,
                maf_layout=maf_layout, D=D),
        out_shape=jax.ShapeDtypeStruct((Bp, LANE), jnp.float32),
        grid=(Bp // Bt,),
        in_specs=[
            pl.BlockSpec((Bt, LANE), lambda i: (i, 0)),
            pl.BlockSpec((Bt, LANE), lambda i: (i, 0)),
            pl.BlockSpec(W.shape, lambda i: (0, 0, 0)),    # weights stay VMEM-resident
            pl.BlockSpec(Bv.shape, lambda i: (0, 0, 0)),   # biases stay VMEM-resident
        ],
        out_specs=pl.BlockSpec((Bt, LANE), lambda i: (i, 0)),
        compiler_params=pltpu.CompilerParams(
            dimension_semantics=("parallel",)),
        cost_estimate=pl.CostEstimate(
            flops=int(flops),
            transcendentals=int(transcendentals),
            bytes_accessed=int(bytes_accessed)),
    )(theta_p, x_p, W, Bv)
    return out[:B, 0]


# --------------------------- parameter initialization -----------------------

def _init_linear(key, fan_in, fan_out):
    kw, kb = jax.random.split(key)
    lim = 1.0 / math.sqrt(fan_in)
    w = jax.random.uniform(kw, (fan_in, fan_out), jnp.float32, -lim, lim)
    b = jax.random.uniform(kb, (fan_out,), jnp.float32, -lim, lim)
    return w, b


def _init_mlp(key, sizes):
    keys = jax.random.split(key, len(sizes) - 1)
    return [_init_linear(k, a, b) for k, a, b in zip(keys, sizes[:-1], sizes[1:])]


def init_embedding_params(key, in_features, out_features, hidden_features):
    # lampe.nn.ResMLP: per (before, after) stage, optional Linear(before, after)
    # projection when dims change, then Residual(MLP(after, after, [2a, 2a])).
    params = []
    keys = jax.random.split(key, 2 * (len(hidden_features) + 1))
    ki = iter(keys)
    befores = (in_features, *hidden_features)
    afters = (*hidden_features, out_features)
    for before, after in zip(befores, afters):
        proj = _init_linear(next(ki), before, after) if before != after else None
        block = _init_mlp(next(ki), [after, 2 * after, 2 * after, after])
        params.append((proj, block))
    return params


def _made_masks(D, E, hidden):
    # MADE degrees: theta inputs 1..D, context inputs 0 (fully connected),
    # hidden degrees in [0, D-1], outputs (shift, log_scale) with degrees 1..D.
    deg_in = jnp.concatenate([jnp.arange(1, D + 1, dtype=jnp.int32),
                              jnp.zeros((E,), jnp.int32)])
    degs = [deg_in]
    for h in hidden:
        degs.append(jnp.arange(h, dtype=jnp.int32) % D)
    deg_out = jnp.concatenate([jnp.arange(1, D + 1, dtype=jnp.int32)] * 2)
    masks = []
    for a, b in zip(degs[:-1], degs[1:]):
        masks.append((b[None, :] >= a[:, None]).astype(jnp.float32))
    masks.append((deg_out[None, :] > degs[-1][:, None]).astype(jnp.float32))
    return masks


def init_maf_params(key, D, context_dim, transforms, hidden):
    masks = _made_masks(D, context_dim, hidden)
    sizes = [D + context_dim, *hidden, 2 * D]
    keys = jax.random.split(key, transforms)
    params = []
    for k in keys:
        layers = _init_mlp(k, sizes)
        # apply autoregressive masks once at init (equivalent to masked matmul)
        params.append([(w * m, b) for (w, b), m in zip(layers, masks)])
    return params


# ----------------------- pack params into VMEM-ready slabs ------------------

def pack_params(emb_params, maf_params, D, E, weight_dtype=jnp.bfloat16):
    w_list, b_list = [], []

    def add(ws, bs):
        w_list.append(ws)
        b_list.append(bs)
        return len(w_list) - 1

    def add_std(w, b):
        ws = jnp.zeros((SLOT, SLOT), jnp.float32).at[:w.shape[0], :w.shape[1]].set(w)
        bs = jnp.zeros((SLOT,), jnp.float32).at[:b.shape[0]].set(b)
        return add(ws, bs)

    emb_layout = []
    for proj, block in emb_params:
        proj_idx = add_std(*proj) if proj is not None else None
        block_idxs = tuple(add_std(w, b) for (w, b) in block)
        emb_layout.append((proj_idx, block_idxs))

    maf_layout = []
    for t, layers in enumerate(maf_params):
        # Fold the alternating order reversal into the weights. The runtime
        # reversal is applied at t = 1, 3, ... and persists, so the cumulative
        # permutation seen by transform t is the reversal iff ((t+1)//2) is odd.
        rev = (((t + 1) // 2) % 2) == 1
        (w1, b1), (w2, b2), (w3, b3) = layers
        H1, H2 = w1.shape[1], w2.shape[1]

        # Fused first MADE layer: activation is [z | ctx] laid out over 256
        # lanes (z in 0:128, ctx in 128:256); weight rows placed to match.
        w1z, w1c = w1[:D, :], w1[D:D + E, :]
        if rev:
            w1z = w1z[::-1, :]                        # permute z-input rows
        ws = (jnp.zeros((SLOT, SLOT), jnp.float32)
              .at[:D, :H1].set(w1z)
              .at[LANE:LANE + E, :H1].set(w1c))
        bs = jnp.zeros((SLOT,), jnp.float32).at[:H1].set(b1)
        i_l1 = add(ws, bs)

        i_l2 = add_std(w2, b2)

        # Fused shift / log-scale heads: shift in cols 0:128, log_s in 128:256.
        wsh, wls = w3[:, :D], w3[:, D:2 * D]
        bsh, bls = b3[:D], b3[D:2 * D]
        if rev:
            wsh, wls = wsh[:, ::-1], wls[:, ::-1]     # permute output columns
            bsh, bls = bsh[::-1], bls[::-1]
        ws = (jnp.zeros((SLOT, SLOT), jnp.float32)
              .at[:H2, :D].set(wsh)
              .at[:H2, LANE:LANE + D].set(wls))
        bs = (jnp.zeros((SLOT,), jnp.float32)
              .at[:D].set(bsh)
              .at[LANE:LANE + D].set(bls))
        i_hd = add(ws, bs)

        maf_layout.append((i_l1, i_l2, i_hd))

    W = jnp.stack(w_list).astype(weight_dtype)    # (N, 256, 256) bf16 ~ 2.4 MiB
    Bv = jnp.stack(b_list)[:, None, :]            # (N, 1, 256) f32
    return W, Bv, tuple(emb_layout), tuple(maf_layout)


# ------------------------- pure-JAX reference (unfused) ---------------------

def _ref_forward(theta, x, emb_params, maf_params, D):
    hi = jax.lax.Precision.HIGHEST

    def run_mlp(h, layers):
        for li, (w, b) in enumerate(layers):
            h = jnp.dot(h, w, precision=hi) + b
            if li < len(layers) - 1:
                h = _elu(h)
        return h

    h = x
    for proj, block in emb_params:
        if proj is not None:
            h = jnp.dot(h, proj[0], precision=hi) + proj[1]
        h = h + run_mlp(h, block)
    ctx = h

    z = theta
    ladj = jnp.zeros((theta.shape[0], 1), jnp.float32)
    for t, layers in enumerate(maf_params):
        if t % 2 == 1:
            z = z[:, ::-1]
        p = run_mlp(jnp.concatenate([z, ctx], axis=-1), layers)
        shift, log_s = p[:, :D], p[:, D:2 * D]
        log_s = 3.0 * jnp.tanh(log_s / 3.0)
        z = z * jnp.exp(log_s) + shift
        ladj = ladj + jnp.sum(log_s, axis=-1, keepdims=True)
    const = 0.5 * D * math.log(2.0 * math.pi)
    return (-0.5 * jnp.sum(z * z, axis=-1, keepdims=True) - const + ladj)[:, 0]


# ------------------------------------ main ----------------------------------

if __name__ == "__main__":
    # Module hyperparameters (small, consistent with the PyTorch __init__):
    NUM_OBS = 16                   # -> embedding input dim = 2 * NUM_OBS = 32
    EMB_OUT = 16                   # embedding_output_dim
    EMB_HIDDEN = (32, 32)          # embedding_hidden_features
    TRANSFORMS = 3                 # number of MAF transforms
    NPE_HIDDEN = (32, 32)          # NPE_hidden_features
    THETA_DIM = 7                  # hard-coded in the module

    key = jax.random.PRNGKey(0)
    k_theta, k_x, k_emb, k_maf = jax.random.split(key, 4)

    emb_params = init_embedding_params(k_emb, 2 * NUM_OBS, EMB_OUT, EMB_HIDDEN)
    maf_params = init_maf_params(k_maf, THETA_DIM, EMB_OUT, TRANSFORMS, NPE_HIDDEN)
    W, Bv, emb_layout, maf_layout = pack_params(emb_params, maf_params,
                                                THETA_DIM, EMB_OUT)

    fwd = jax.jit(partial(npe_with_embedding_forward, W=W, Bv=Bv,
                          emb_layout=emb_layout, maf_layout=maf_layout,
                          D=THETA_DIM))

    # Small batch (single tile) ...
    B = 8
    theta = jax.random.normal(k_theta, (B, THETA_DIM), jnp.float32)
    x = jax.random.normal(k_x, (B, 2 * NUM_OBS), jnp.float32)
    out = jax.block_until_ready(fwd(theta, x))
    assert out.shape == (B,) and out.dtype == jnp.float32
    assert bool(jnp.all(jnp.isfinite(out)))
    ref = jax.block_until_ready(
        _ref_forward(theta, x, emb_params, maf_params, THETA_DIM))
    # Tolerance absorbs bf16 matmul inputs (f32 accumulation, f32 elementwise).
    assert bool(jnp.allclose(out, ref, rtol=5e-2, atol=5e-1)), (out, ref)

    # ... and a larger, non-multiple batch to exercise batch tiling / row pad.
    B2 = 200
    k_t2, k_x2 = jax.random.split(jax.random.PRNGKey(1))
    theta2 = jax.random.normal(k_t2, (B2, THETA_DIM), jnp.float32)
    x2 = jax.random.normal(k_x2, (B2, 2 * NUM_OBS), jnp.float32)
    out2 = jax.block_until_ready(fwd(theta2, x2))
    assert out2.shape == (B2,) and bool(jnp.all(jnp.isfinite(out2)))
    ref2 = jax.block_until_ready(
        _ref_forward(theta2, x2, emb_params, maf_params, THETA_DIM))
    assert bool(jnp.allclose(out2, ref2, rtol=5e-2, atol=5e-1)), (out2, ref2)

    print("KERNEL_OK")
</pallas_src>

<mosaic_0001>
module attributes {stable_mosaic.version = 11 : i64} {
  func.func @_fused_npe_kernel(%arg0: i32, %arg1: memref<8x128xf32, #tpu.memory_space<vmem>>, %arg2: memref<8x128xf32, #tpu.memory_space<vmem>>, %arg3: memref<19x256x256xbf16, #tpu.memory_space<vmem>>, %arg4: memref<19x1x256xf32, #tpu.memory_space<vmem>>, %arg5: memref<8x128xf32, #tpu.memory_space<vmem>>) attributes {dimension_semantics = [#tpu.dimension_semantics<parallel>], iteration_bounds = array<i64: 1>, scalar_prefetch = 0 : i64, scratch_operands = 0 : i64, tpu.core_type = #tpu.core_type<tc>, window_params = [{transform_indices = @transform_0, window_bounds = array<i64: 8, 128>}, {transform_indices = @transform_1, window_bounds = array<i64: 8, 128>}, {pipeline_mode = #tpu.pipeline_mode<synchronous>, transform_indices = @transform_2, window_bounds = array<i64: 19, 256, 256>}, {pipeline_mode = #tpu.pipeline_mode<synchronous>, transform_indices = @transform_3, window_bounds = array<i64: 19, 1, 256>}, {transform_indices = @transform_4, window_bounds = array<i64: 8, 128>}]} {
    %c0 = arith.constant 0 : index
    %c0_0 = arith.constant 0 : index
    %0 = vector.load %arg2[%c0, %c0_0] : memref<8x128xf32, #tpu.memory_space<vmem>>, vector<8x128xf32>
    %c0_1 = arith.constant 0 : index
    %c0_2 = arith.constant 0 : index
    %c0_3 = arith.constant 0 : index
    %1 = vector.load %arg3[%c0_1, %c0_2, %c0_3] : memref<19x256x256xbf16, #tpu.memory_space<vmem>>, vector<1x128x128xbf16>
    %2 = vector.shape_cast %1 : vector<1x128x128xbf16> to vector<128x128xbf16>
    %3 = arith.truncf %0 : vector<8x128xf32> to vector<8x128xbf16>
    %cst = arith.constant dense<0.000000e+00> : vector<8x128xf32>
    %4 = tpu.matmul %3, %2, %cst {dimension_numbers = #tpu.dot_dimension_numbers<[1], [0], [0], [1], [0, 0, 1, 1], [], []>} : vector<8x128xbf16>, vector<128x128xbf16>, vector<8x128xf32> -> vector<8x128xf32>
    %c0_4 = arith.constant 0 : index
    %c0_5 = arith.constant 0 : index
    %c0_6 = arith.constant 0 : index
    %5 = vector.load %arg4[%c0_4, %c0_5, %c0_6] : memref<19x1x256xf32, #tpu.memory_space<vmem>>, vector<1x1x256xf32>
    %6 = vector.shape_cast %5 : vector<1x1x256xf32> to vector<1x256xf32>
    %7 = vector.extract_strided_slice %6 {offsets = [0, 0], sizes = [1, 128], strides = [1, 1]} : vector<1x256xf32> to vector<1x128xf32>
    %8 = vector.broadcast %7 : vector<1x128xf32> to vector<8x128xf32>
    %9 = arith.addf %4, %8 : vector<8x128xf32>
    %cst_7 = arith.constant 0.000000e+00 : f32
    %10 = vector.broadcast %cst_7 : f32 to vector<8x128xf32>
    %11 = arith.cmpf ogt, %9, %10 : vector<8x128xf32>
    %cst_8 = arith.constant 0.000000e+00 : f32
    %12 = vector.broadcast %cst_8 : f32 to vector<8x128xf32>
    %13 = arith.minimumf %9, %12 : vector<8x128xf32>
    %14 = math.exp %13 : vector<8x128xf32>
    %cst_9 = arith.constant 1.000000e+00 : f32
    %15 = vector.broadcast %cst_9 : f32 to vector<8x128xf32>
    %16 = arith.subf %14, %15 : vector<8x128xf32>
    %17 = arith.select %11, %9, %16 : vector<8x128xi1>, vector<8x128xf32>
    %c1 = arith.constant 1 : index
    %c0_10 = arith.constant 0 : index
    %c0_11 = arith.constant 0 : index
    %18 = vector.load %arg3[%c1, %c0_10, %c0_11] : memref<19x256x256xbf16, #tpu.memory_space<vmem>>, vector<1x128x128xbf16>
    %19 = vector.shape_cast %18 : vector<1x128x128xbf16> to vector<128x128xbf16>
    %20 = arith.truncf %17 : vector<8x128xf32> to vector<8x128xbf16>
    %cst_12 = arith.constant dense<0.000000e+00> : vector<8x128xf32>
    %21 = tpu.matmul %20, %19, %cst_12 {dimension_numbers = #tpu.dot_dimension_numbers<[1], [0], [0], [1], [0, 0, 1, 1], [], []>} : vector<8x128xbf16>, vector<128x128xbf16>, vector<8x128xf32> -> vector<8x128xf32>
    %c1_13 = arith.constant 1 : index
    %c0_14 = arith.constant 0 : index
    %c0_15 = arith.constant 0 : index
    %22 = vector.load %arg4[%c1_13, %c0_14, %c0_15] : memref<19x1x256xf32, #tpu.memory_space<vmem>>, vector<1x1x256xf32>
    %23 = vector.shape_cast %22 : vector<1x1x256xf32> to vector<1x256xf32>
    %24 = vector.extract_strided_slice %23 {offsets = [0, 0], sizes = [1, 128], strides = [1, 1]} : vector<1x256xf32> to vector<1x128xf32>
    %25 = vector.broadcast %24 : vector<1x128xf32> to vector<8x128xf32>
    %26 = arith.addf %21, %25 : vector<8x128xf32>
    %cst_16 = arith.constant 0.000000e+00 : f32
    %27 = vector.broadcast %cst_16 : f32 to vector<8x128xf32>
    %28 = arith.cmpf ogt, %26, %27 : vector<8x128xf32>
    %cst_17 = arith.constant 0.000000e+00 : f32
    %29 = vector.broadcast %cst_17 : f32 to vector<8x128xf32>
    %30 = arith.minimumf %26, %29 : vector<8x128xf32>
    %31 = math.exp %30 : vector<8x128xf32>
    %cst_18 = arith.constant 1.000000e+00 : f32
    %32 = vector.broadcast %cst_18 : f32 to vector<8x128xf32>
    %33 = arith.subf %31, %32 : vector<8x128xf32>
    %34 = arith.select %28, %26, %33 : vector<8x128xi1>, vector<8x128xf32>
    %c2 = arith.constant 2 : index
    %c0_19 = arith.constant 0 : index
    %c0_20 = arith.constant 0 : index
    %35 = vector.load %arg3[%c2, %c0_19, %c0_20] : memref<19x256x256xbf16, #tpu.memory_space<vmem>>, vector<1x128x128xbf16>
    %36 = vector.shape_cast %35 : vector<1x128x128xbf16> to vector<128x128xbf16>
    %37 = arith.truncf %34 : vector<8x128xf32> to vector<8x128xbf16>
    %cst_21 = arith.constant dense<0.000000e+00> : vector<8x128xf32>
    %38 = tpu.matmul %37, %36, %cst_21 {dimension_numbers = #tpu.dot_dimension_numbers<[1], [0], [0], [1], [0, 0, 1, 1], [], []>} : vector<8x128xbf16>, vector<128x128xbf16>, vector<8x128xf32> -> vector<8x128xf32>
    %c2_22 = arith.constant 2 : index
    %c0_23 = arith.constant 0 : index
    %c0_24 = arith.constant 0 : index
    %39 = vector.load %arg4[%c2_22, %c0_23, %c0_24] : memref<19x1x256xf32, #tpu.memory_space<vmem>>, vector<1x1x256xf32>
    %40 = vector.shape_cast %39 : vector<1x1x256xf32> to vector<1x256xf32>
    %41 = vector.extract_strided_slice %40 {offsets = [0, 0], sizes = [1, 128], strides = [1, 1]} : vector<1x256xf32> to vector<1x128xf32>
    %42 = vector.broadcast %41 : vector<1x128xf32> to vector<8x128xf32>
    %43 = arith.addf %38, %42 : vector<8x128xf32>
    %44 = arith.addf %0, %43 : vector<8x128xf32>
    %c3 = arith.constant 3 : index
    %c0_25 = arith.constant 0 : index
    %c0_26 = arith.constant 0 : index
    %45 = vector.load %arg3[%c3, %c0_25, %c0_26] : memref<19x256x256xbf16, #tpu.memory_space<vmem>>, vector<1x128x128xbf16>
    %46 = vector.shape_cast %45 : vector<1x128x128xbf16> to vector<128x128xbf16>
    %47 = arith.truncf %44 : vector<8x128xf32> to vector<8x128xbf16>
    %cst_27 = arith.constant dense<0.000000e+00> : vector<8x128xf32>
    %48 = tpu.matmul %47, %46, %cst_27 {dimension_numbers = #tpu.dot_dimension_numbers<[1], [0], [0], [1], [0, 0, 1, 1], [], []>} : vector<8x128xbf16>, vector<128x128xbf16>, vector<8x128xf32> -> vector<8x128xf32>
    %c3_28 = arith.constant 3 : index
    %c0_29 = arith.constant 0 : index
    %c0_30 = arith.constant 0 : index
    %49 = vector.load %arg4[%c3_28, %c0_29, %c0_30] : memref<19x1x256xf32, #tpu.memory_space<vmem>>, vector<1x1x256xf32>
    %50 = vector.shape_cast %49 : vector<1x1x256xf32> to vector<1x256xf32>
    %51 = vector.extract_strided_slice %50 {offsets = [0, 0], sizes = [1, 128], strides = [1, 1]} : vector<1x256xf32> to vector<1x128xf32>
    %52 = vector.broadcast %51 : vector<1x128xf32> to vector<8x128xf32>
    %53 = arith.addf %48, %52 : vector<8x128xf32>
    %cst_31 = arith.constant 0.000000e+00 : f32
    %54 = vector.broadcast %cst_31 : f32 to vector<8x128xf32>
    %55 = arith.cmpf ogt, %53, %54 : vector<8x128xf32>
    %cst_32 = arith.constant 0.000000e+00 : f32
    %56 = vector.broadcast %cst_32 : f32 to vector<8x128xf32>
    %57 = arith.minimumf %53, %56 : vector<8x128xf32>
    %58 = math.exp %57 : vector<8x128xf32>
    %cst_33 = arith.constant 1.000000e+00 : f32
    %59 = vector.broadcast %cst_33 : f32 to vector<8x128xf32>
    %60 = arith.subf %58, %59 : vector<8x128xf32>
    %61 = arith.select %55, %53, %60 : vector<8x128xi1>, vector<8x128xf32>
    %c4 = arith.constant 4 : index
    %c0_34 = arith.constant 0 : index
    %c0_35 = arith.constant 0 : index
    %62 = vector.load %arg3[%c4, %c0_34, %c0_35] : memref<19x256x256xbf16, #tpu.memory_space<vmem>>, vector<1x128x128xbf16>
    %63 = vector.shape_cast %62 : vector<1x128x128xbf16> to vector<128x128xbf16>
    %64 = arith.truncf %61 : vector<8x128xf32> to vector<8x128xbf16>
    %cst_36 = arith.constant dense<0.000000e+00> : vector<8x128xf32>
    %65 = tpu.matmul %64, %63, %cst_36 {dimension_numbers = #tpu.dot_dimension_numbers<[1], [0], [0], [1], [0, 0, 1, 1], [], []>} : vector<8x128xbf16>, vector<128x128xbf16>, vector<8x128xf32> -> vector<8x128xf32>
    %c4_37 = arith.constant 4 : index
    %c0_38 = arith.constant 0 : index
    %c0_39 = arith.constant 0 : index
    %66 = vector.load %arg4[%c4_37, %c0_38, %c0_39] : memref<19x1x256xf32, #tpu.memory_space<vmem>>, vector<1x1x256xf32>
    %67 = vector.shape_cast %66 : vector<1x1x256xf32> to vector<1x256xf32>
    %68 = vector.extract_strided_slice %67 {offsets = [0, 0], sizes = [1, 128], strides = [1, 1]} : vector<1x256xf32> to vector<1x128xf32>
    %69 = vector.broadcast %68 : vector<1x128xf32> to vector<8x128xf32>
    %70 = arith.addf %65, %69 : vector<8x128xf32>
    %cst_40 = arith.constant 0.000000e+00 : f32
    %71 = vector.broadcast %cst_40 : f32 to vector<8x128xf32>
    %72 = arith.cmpf ogt, %70, %71 : vector<8x128xf32>
    %cst_41 = arith.constant 0.000000e+00 : f32
    %73 = vector.broadcast %cst_41 : f32 to vector<8x128xf32>
    %74 = arith.minimumf %70, %73 : vector<8x128xf32>
    %75 = math.exp %74 : vector<8x128xf32>
    %cst_42 = arith.constant 1.000000e+00 : f32
    %76 = vector.broadcast %cst_42 : f32 to vector<8x128xf32>
    %77 = arith.subf %75, %76 : vector<8x128xf32>
    %78 = arith.select %72, %70, %77 : vector<8x128xi1>, vector<8x128xf32>
    %c5 = arith.constant 5 : index
    %c0_43 = arith.constant 0 : index
    %c0_44 = arith.constant 0 : index
    %79 = vector.load %arg3[%c5, %c0_43, %c0_44] : memref<19x256x256xbf16, #tpu.memory_space<vmem>>, vector<1x128x128xbf16>
    %80 = vector.shape_cast %79 : vector<1x128x128xbf16> to vector<128x128xbf16>
    %81 = arith.truncf %78 : vector<8x128xf32> to vector<8x128xbf16>
    %cst_45 = arith.constant dense<0.000000e+00> : vector<8x128xf32>
    %82 = tpu.matmul %81, %80, %cst_45 {dimension_numbers = #tpu.dot_dimension_numbers<[1], [0], [0], [1], [0, 0, 1, 1], [], []>} : vector<8x128xbf16>, vector<128x128xbf16>, vector<8x128xf32> -> vector<8x128xf32>
    %c5_46 = arith.constant 5 : index
    %c0_47 = arith.constant 0 : index
    %c0_48 = arith.constant 0 : index
    %83 = vector.load %arg4[%c5_46, %c0_47, %c0_48] : memref<19x1x256xf32, #tpu.memory_space<vmem>>, vector<1x1x256xf32>
    %84 = vector.shape_cast %83 : vector<1x1x256xf32> to vector<1x256xf32>
    %85 = vector.extract_strided_slice %84 {offsets = [0, 0], sizes = [1, 128], strides = [1, 1]} : vector<1x256xf32> to vector<1x128xf32>
    %86 = vector.broadcast %85 : vector<1x128xf32> to vector<8x128xf32>
    %87 = arith.addf %82, %86 : vector<8x128xf32>
    %88 = arith.addf %44, %87 : vector<8x128xf32>
    %c6 = arith.constant 6 : index
    %c0_49 = arith.constant 0 : index
    %c0_50 = arith.constant 0 : index
    %89 = vector.load %arg3[%c6, %c0_49, %c0_50] : memref<19x256x256xbf16, #tpu.memory_space<vmem>>, vector<1x128x128xbf16>
    %90 = vector.shape_cast %89 : vector<1x128x128xbf16> to vector<128x128xbf16>
    %91 = arith.truncf %88 : vector<8x128xf32> to vector<8x128xbf16>
    %cst_51 = arith.constant dense<0.000000e+00> : vector<8x128xf32>
    %92 = tpu.matmul %91, %90, %cst_51 {dimension_numbers = #tpu.dot_dimension_numbers<[1], [0], [0], [1], [0, 0, 1, 1], [], []>} : vector<8x128xbf16>, vector<128x128xbf16>, vector<8x128xf32> -> vector<8x128xf32>
    %c6_52 = arith.constant 6 : index
    %c0_53 = arith.constant 0 : index
    %c0_54 = arith.constant 0 : index
    %93 = vector.load %arg4[%c6_52, %c0_53, %c0_54] : memref<19x1x256xf32, #tpu.memory_space<vmem>>, vector<1x1x256xf32>
    %94 = vector.shape_cast %93 : vector<1x1x256xf32> to vector<1x256xf32>
    %95 = vector.extract_strided_slice %94 {offsets = [0, 0], sizes = [1, 128], strides = [1, 1]} : vector<1x256xf32> to vector<1x128xf32>
    %96 = vector.broadcast %95 : vector<1x128xf32> to vector<8x128xf32>
    %97 = arith.addf %92, %96 : vector<8x128xf32>
    %c7 = arith.constant 7 : index
    %c0_55 = arith.constant 0 : index
    %c0_56 = arith.constant 0 : index
    %98 = vector.load %arg3[%c7, %c0_55, %c0_56] : memref<19x256x256xbf16, #tpu.memory_space<vmem>>, vector<1x128x128xbf16>
    %99 = vector.shape_cast %98 : vector<1x128x128xbf16> to vector<128x128xbf16>
    %100 = arith.truncf %97 : vector<8x128xf32> to vector<8x128xbf16>
    %cst_57 = arith.constant dense<0.000000e+00> : vector<8x128xf32>
    %101 = tpu.matmul %100, %99, %cst_57 {dimension_numbers = #tpu.dot_dimension_numbers<[1], [0], [0], [1], [0, 0, 1, 1], [], []>} : vector<8x128xbf16>, vector<128x128xbf16>, vector<8x128xf32> -> vector<8x128xf32>
    %c7_58 = arith.constant 7 : index
    %c0_59 = arith.constant 0 : index
    %c0_60 = arith.constant 0 : index
    %102 = vector.load %arg4[%c7_58, %c0_59, %c0_60] : memref<19x1x256xf32, #tpu.memory_space<vmem>>, vector<1x1x256xf32>
    %103 = vector.shape_cast %102 : vector<1x1x256xf32> to vector<1x256xf32>
    %104 = vector.extract_strided_slice %103 {offsets = [0, 0], sizes = [1, 128], strides = [1, 1]} : vector<1x256xf32> to vector<1x128xf32>
    %105 = vector.broadcast %104 : vector<1x128xf32> to vector<8x128xf32>
    %106 = arith.addf %101, %105 : vector<8x128xf32>
    %cst_61 = arith.constant 0.000000e+00 : f32
    %107 = vector.broadcast %cst_61 : f32 to vector<8x128xf32>
    %108 = arith.cmpf ogt, %106, %107 : vector<8x128xf32>
    %cst_62 = arith.constant 0.000000e+00 : f32
    %109 = vector.broadcast %cst_62 : f32 to vector<8x128xf32>
    %110 = arith.minimumf %106, %109 : vector<8x128xf32>
    %111 = math.exp %110 : vector<8x128xf32>
    %cst_63 = arith.constant 1.000000e+00 : f32
    %112 = vector.broadcast %cst_63 : f32 to vector<8x128xf32>
    %113 = arith.subf %111, %112 : vector<8x128xf32>
    %114 = arith.select %108, %106, %113 : vector<8x128xi1>, vector<8x128xf32>
    %c8 = arith.constant 8 : index
    %c0_64 = arith.constant 0 : index
    %c0_65 = arith.constant 0 : index
    %115 = vector.load %arg3[%c8, %c0_64, %c0_65] : memref<19x256x256xbf16, #tpu.memory_space<vmem>>, vector<1x128x128xbf16>
    %116 = vector.shape_cast %115 : vector<1x128x128xbf16> to vector<128x128xbf16>
    %117 = arith.truncf %114 : vector<8x128xf32> to vector<8x128xbf16>
    %cst_66 = arith.constant dense<0.000000e+00> : vector<8x128xf32>
    %118 = tpu.matmul %117, %116, %cst_66 {dimension_numbers = #tpu.dot_dimension_numbers<[1], [0], [0], [1], [0, 0, 1, 1], [], []>} : vector<8x128xbf16>, vector<128x128xbf16>, vector<8x128xf32> -> vector<8x128xf32>
    %c8_67 = arith.constant 8 : index
    %c0_68 = arith.constant 0 : index
    %c0_69 = arith.constant 0 : index
    %119 = vector.load %arg4[%c8_67, %c0_68, %c0_69] : memref<19x1x256xf32, #tpu.memory_space<vmem>>, vector<1x1x256xf32>
    %120 = vector.shape_cast %119 : vector<1x1x256xf32> to vector<1x256xf32>
    %121 = vector.extract_strided_slice %120 {offsets = [0, 0], sizes = [1, 128], strides = [1, 1]} : vector<1x256xf32> to vector<1x128xf32>
    %122 = vector.broadcast %121 : vector<1x128xf32> to vector<8x128xf32>
    %123 = arith.addf %118, %122 : vector<8x128xf32>
    %cst_70 = arith.constant 0.000000e+00 : f32
    %124 = vector.broadcast %cst_70 : f32 to vector<8x128xf32>
    %125 = arith.cmpf ogt, %123, %124 : vector<8x128xf32>
    %cst_71 = arith.constant 0.000000e+00 : f32
    %126 = vector.broadcast %cst_71 : f32 to vector<8x128xf32>
    %127 = arith.minimumf %123, %126 : vector<8x128xf32>
    %128 = math.exp %127 : vector<8x128xf32>
    %cst_72 = arith.constant 1.000000e+00 : f32
    %129 = vector.broadcast %cst_72 : f32 to vector<8x128xf32>
    %130 = arith.subf %128, %129 : vector<8x128xf32>
    %131 = arith.select %125, %123, %130 : vector<8x128xi1>, vector<8x128xf32>
    %c9 = arith.constant 9 : index
    %c0_73 = arith.constant 0 : index
    %c0_74 = arith.constant 0 : index
    %132 = vector.load %arg3[%c9, %c0_73, %c0_74] : memref<19x256x256xbf16, #tpu.memory_space<vmem>>, vector<1x128x128xbf16>
    %133 = vector.shape_cast %132 : vector<1x128x128xbf16> to vector<128x128xbf16>
    %134 = arith.truncf %131 : vector<8x128xf32> to vector<8x128xbf16>
    %cst_75 = arith.constant dense<0.000000e+00> : vector<8x128xf32>
    %135 = tpu.matmul %134, %133, %cst_75 {dimension_numbers = #tpu.dot_dimension_numbers<[1], [0], [0], [1], [0, 0, 1, 1], [], []>} : vector<8x128xbf16>, vector<128x128xbf16>, vector<8x128xf32> -> vector<8x128xf32>
    %c9_76 = arith.constant 9 : index
    %c0_77 = arith.constant 0 : index
    %c0_78 = arith.constant 0 : index
    %136 = vector.load %arg4[%c9_76, %c0_77, %c0_78] : memref<19x1x256xf32, #tpu.memory_space<vmem>>, vector<1x1x256xf32>
    %137 = vector.shape_cast %136 : vector<1x1x256xf32> to vector<1x256xf32>
    %138 = vector.extract_strided_slice %137 {offsets = [0, 0], sizes = [1, 128], strides = [1, 1]} : vector<1x256xf32> to vector<1x128xf32>
    %139 = vector.broadcast %138 : vector<1x128xf32> to vector<8x128xf32>
    %140 = arith.addf %135, %139 : vector<8x128xf32>
    %141 = arith.addf %97, %140 : vector<8x128xf32>
    %142 = arith.truncf %141 : vector<8x128xf32> to vector<8x128xbf16>
    %c0_79 = arith.constant 0 : index
    %c0_80 = arith.constant 0 : index
    %143 = vector.load %arg1[%c0_79, %c0_80] : memref<8x128xf32, #tpu.memory_space<vmem>>, vector<8x128xf32>
    %cst_81 = arith.constant 0.000000e+00 : f32
    %144 = vector.broadcast %cst_81 : f32 to vector<8x128xf32>
    %145 = arith.truncf %143 : vector<8x128xf32> to vector<8x128xbf16>
    %146 = tpu.concatenate %145, %142 in 1 : vector<8x128xbf16>, vector<8x128xbf16> -> vector<8x256xbf16>
    %c10 = arith.constant 10 : index
    %c0_82 = arith.constant 0 : index
    %c0_83 = arith.constant 0 : index
    %147 = vector.load %arg3[%c10, %c0_82, %c0_83] : memref<19x256x256xbf16, #tpu.memory_space<vmem>>, vector<1x256x128xbf16>
    %148 = vector.shape_cast %147 : vector<1x256x128xbf16> to vector<256x128xbf16>
    %cst_84 = arith.constant dense<0.000000e+00> : vector<8x128xf32>
    %149 = tpu.matmul %146, %148, %cst_84 {dimension_numbers = #tpu.dot_dimension_numbers<[1], [0], [0], [1], [0, 0, 1, 1], [], []>} : vector<8x256xbf16>, vector<256x128xbf16>, vector<8x128xf32> -> vector<8x128xf32>
    %c10_85 = arith.constant 10 : index
    %c0_86 = arith.constant 0 : index
    %c0_87 = arith.constant 0 : index
    %150 = vector.load %arg4[%c10_85, %c0_86, %c0_87] : memref<19x1x256xf32, #tpu.memory_space<vmem>>, vector<1x1x256xf32>
    %151 = vector.shape_cast %150 : vector<1x1x256xf32> to vector<1x256xf32>
    %152 = vector.extract_strided_slice %151 {offsets = [0, 0], sizes = [1, 128], strides = [1, 1]} : vector<1x256xf32> to vector<1x128xf32>
    %153 = vector.broadcast %152 : vector<1x128xf32> to vector<8x128xf32>
    %154 = arith.addf %149, %153 : vector<8x128xf32>
    %cst_88 = arith.constant 0.000000e+00 : f32
    %155 = vector.broadcast %cst_88 : f32 to vector<8x128xf32>
    %156 = arith.cmpf ogt, %154, %155 : vector<8x128xf32>
    %cst_89 = arith.constant 0.000000e+00 : f32
    %157 = vector.broadcast %cst_89 : f32 to vector<8x128xf32>
    %158 = arith.minimumf %154, %157 : vector<8x128xf32>
    %159 = math.exp %158 : vector<8x128xf32>
    %cst_90 = arith.constant 1.000000e+00 : f32
    %160 = vector.broadcast %cst_90 : f32 to vector<8x128xf32>
    %161 = arith.subf %159, %160 : vector<8x128xf32>
    %162 = arith.select %156, %154, %161 : vector<8x128xi1>, vector<8x128xf32>
    %c11 = arith.constant 11 : index
    %c0_91 = arith.constant 0 : index
    %c0_92 = arith.constant 0 : index
    %163 = vector.load %arg3[%c11, %c0_91, %c0_92] : memref<19x256x256xbf16, #tpu.memory_space<vmem>>, vector<1x128x128xbf16>
    %164 = vector.shape_cast %163 : vector<1x128x128xbf16> to vector<128x128xbf16>
    %165 = arith.truncf %162 : vector<8x128xf32> to vector<8x128xbf16>
    %cst_93 = arith.constant dense<0.000000e+00> : vector<8x128xf32>
    %166 = tpu.matmul %165, %164, %cst_93 {dimension_numbers = #tpu.dot_dimension_numbers<[1], [0], [0], [1], [0, 0, 1, 1], [], []>} : vector<8x128xbf16>, vector<128x128xbf16>, vector<8x128xf32> -> vector<8x128xf32>
    %c11_94 = arith.constant 11 : index
    %c0_95 = arith.constant 0 : index
    %c0_96 = arith.constant 0 : index
    %167 = vector.load %arg4[%c11_94, %c0_95, %c0_96] : memref<19x1x256xf32, #tpu.memory_space<vmem>>, vector<1x1x256xf32>
    %168 = vector.shape_cast %167 : vector<1x1x256xf32> to vector<1x256xf32>
    %169 = vector.extract_strided_slice %168 {offsets = [0, 0], sizes = [1, 128], strides = [1, 1]} : vector<1x256xf32> to vector<1x128xf32>
    %170 = vector.broadcast %169 : vector<1x128xf32> to vector<8x128xf32>
    %171 = arith.addf %166, %170 : vector<8x128xf32>
    %cst_97 = arith.constant 0.000000e+00 : f32
    %172 = vector.broadcast %cst_97 : f32 to vector<8x128xf32>
    %173 = arith.cmpf ogt, %171, %172 : vector<8x128xf32>
    %cst_98 = arith.constant 0.000000e+00 : f32
    %174 = vector.broadcast %cst_98 : f32 to vector<8x128xf32>
    %175 = arith.minimumf %171, %174 : vector<8x128xf32>
    %176 = math.exp %175 : vector<8x128xf32>
    %cst_99 = arith.constant 1.000000e+00 : f32
    %177 = vector.broadcast %cst_99 : f32 to vector<8x128xf32>
    %178 = arith.subf %176, %177 : vector<8x128xf32>
    %179 = arith.select %173, %171, %178 : vector<8x128xi1>, vector<8x128xf32>
    %180 = arith.truncf %179 : vector<8x128xf32> to vector<8x128xbf16>
    %c12 = arith.constant 12 : index
    %c0_100 = arith.constant 0 : index
    %c0_101 = arith.constant 0 : index
    %181 = vector.load %arg3[%c12, %c0_100, %c0_101] : memref<19x256x256xbf16, #tpu.memory_space<vmem>>, vector<1x128x256xbf16>
    %182 = vector.shape_cast %181 : vector<1x128x256xbf16> to vector<128x256xbf16>
    %cst_102 = arith.constant dense<0.000000e+00> : vector<8x256xf32>
    %183 = tpu.matmul %180, %182, %cst_102 {dimension_numbers = #tpu.dot_dimension_numbers<[1], [0], [0], [1], [0, 0, 1, 1], [], []>} : vector<8x128xbf16>, vector<128x256xbf16>, vector<8x256xf32> -> vector<8x256xf32>
    %c12_103 = arith.constant 12 : index
    %c0_104 = arith.constant 0 : index
    %c0_105 = arith.constant 0 : index
    %184 = vector.load %arg4[%c12_103, %c0_104, %c0_105] : memref<19x1x256xf32, #tpu.memory_space<vmem>>, vector<1x1x256xf32>
    %185 = vector.shape_cast %184 : vector<1x1x256xf32> to vector<1x256xf32>
    %186 = vector.broadcast %185 : vector<1x256xf32> to vector<8x256xf32>
    %187 = arith.addf %183, %186 : vector<8x256xf32>
    %188 = vector.extract_strided_slice %187 {offsets = [0, 0], sizes = [8, 128], strides = [1, 1]} : vector<8x256xf32> to vector<8x128xf32>
    %189 = vector.extract_strided_slice %187 {offsets = [0, 128], sizes = [8, 128], strides = [1, 1]} : vector<8x256xf32> to vector<8x128xf32>
    %cst_106 = arith.constant 0.333333343 : f32
    %190 = vector.broadcast %cst_106 : f32 to vector<8x128xf32>
    %191 = arith.mulf %189, %190 : vector<8x128xf32>
    %192 = math.tanh %191 : vector<8x128xf32>
    %cst_107 = arith.constant 3.000000e+00 : f32
    %193 = vector.broadcast %cst_107 : f32 to vector<8x128xf32>
    %194 = arith.mulf %193, %192 : vector<8x128xf32>
    %195 = math.exp %194 : vector<8x128xf32>
    %196 = arith.mulf %143, %195 : vector<8x128xf32>
    %197 = arith.addf %196, %188 : vector<8x128xf32>
    %198 = arith.addf %144, %194 : vector<8x128xf32>
    %199 = arith.truncf %197 : vector<8x128xf32> to vector<8x128xbf16>
    %200 = tpu.concatenate %199, %142 in 1 : vector<8x128xbf16>, vector<8x128xbf16> -> vector<8x256xbf16>
    %c13 = arith.constant 13 : index
    %c0_108 = arith.constant 0 : index
    %c0_109 = arith.constant 0 : index
    %201 = vector.load %arg3[%c13, %c0_108, %c0_109] : memref<19x256x256xbf16, #tpu.memory_space<vmem>>, vector<1x256x128xbf16>
    %202 = vector.shape_cast %201 : vector<1x256x128xbf16> to vector<256x128xbf16>
    %cst_110 = arith.constant dense<0.000000e+00> : vector<8x128xf32>
    %203 = tpu.matmul %200, %202, %cst_110 {dimension_numbers = #tpu.dot_dimension_numbers<[1], [0], [0], [1], [0, 0, 1, 1], [], []>} : vector<8x256xbf16>, vector<256x128xbf16>, vector<8x128xf32> -> vector<8x128xf32>
    %c13_111 = arith.constant 13 : index
    %c0_112 = arith.constant 0 : index
    %c0_113 = arith.constant 0 : index
    %204 = vector.load %arg4[%c13_111, %c0_112, %c0_113] : memref<19x1x256xf32, #tpu.memory_space<vmem>>, vector<1x1x256xf32>
    %205 = vector.shape_cast %204 : vector<1x1x256xf32> to vector<1x256xf32>
    %206 = vector.extract_strided_slice %205 {offsets = [0, 0], sizes = [1, 128], strides = [1, 1]} : vector<1x256xf32> to vector<1x128xf32>
    %207 = vector.broadcast %206 : vector<1x128xf32> to vector<8x128xf32>
    %208 = arith.addf %203, %207 : vector<8x128xf32>
    %cst_114 = arith.constant 0.000000e+00 : f32
    %209 = vector.broadcast %cst_114 : f32 to vector<8x128xf32>
    %210 = arith.cmpf ogt, %208, %209 : vector<8x128xf32>
    %cst_115 = arith.constant 0.000000e+00 : f32
    %211 = vector.broadcast %cst_115 : f32 to vector<8x128xf32>
    %212 = arith.minimumf %208, %211 : vector<8x128xf32>
    %213 = math.exp %212 : vector<8x128xf32>
    %cst_116 = arith.constant 1.000000e+00 : f32
    %214 = vector.broadcast %cst_116 : f32 to vector<8x128xf32>
    %215 = arith.subf %213, %214 : vector<8x128xf32>
    %216 = arith.select %210, %208, %215 : vector<8x128xi1>, vector<8x128xf32>
    %c14 = arith.constant 14 : index
    %c0_117 = arith.constant 0 : index
    %c0_118 = arith.constant 0 : index
    %217 = vector.load %arg3[%c14, %c0_117, %c0_118] : memref<19x256x256xbf16, #tpu.memory_space<vmem>>, vector<1x128x128xbf16>
    %218 = vector.shape_cast %217 : vector<1x128x128xbf16> to vector<128x128xbf16>
    %219 = arith.truncf %216 : vector<8x128xf32> to vector<8x128xbf16>
    %cst_119 = arith.constant dense<0.000000e+00> : vector<8x128xf32>
    %220 = tpu.matmul %219, %218, %cst_119 {dimension_numbers = #tpu.dot_dimension_numbers<[1], [0], [0], [1], [0, 0, 1, 1], [], []>} : vector<8x128xbf16>, vector<128x128xbf16>, vector<8x128xf32> -> vector<8x128xf32>
    %c14_120 = arith.constant 14 : index
    %c0_121 = arith.constant 0 : index
    %c0_122 = arith.constant 0 : index
    %221 = vector.load %arg4[%c14_120, %c0_121, %c0_122] : memref<19x1x256xf32, #tpu.memory_space<vmem>>, vector<1x1x256xf32>
    %222 = vector.shape_cast %221 : vector<1x1x256xf32> to vector<1x256xf32>
    %223 = vector.extract_strided_slice %222 {offsets = [0, 0], sizes = [1, 128], strides = [1, 1]} : vector<1x256xf32> to vector<1x128xf32>
    %224 = vector.broadcast %223 : vector<1x128xf32> to vector<8x128xf32>
    %225 = arith.addf %220, %224 : vector<8x128xf32>
    %cst_123 = arith.constant 0.000000e+00 : f32
    %226 = vector.broadcast %cst_123 : f32 to vector<8x128xf32>
    %227 = arith.cmpf ogt, %225, %226 : vector<8x128xf32>
    %cst_124 = arith.constant 0.000000e+00 : f32
    %228 = vector.broadcast %cst_124 : f32 to vector<8x128xf32>
    %229 = arith.minimumf %225, %228 : vector<8x128xf32>
    %230 = math.exp %229 : vector<8x128xf32>
    %cst_125 = arith.constant 1.000000e+00 : f32
    %231 = vector.broadcast %cst_125 : f32 to vector<8x128xf32>
    %232 = arith.subf %230, %231 : vector<8x128xf32>
    %233 = arith.select %227, %225, %232 : vector<8x128xi1>, vector<8x128xf32>
    %234 = arith.truncf %233 : vector<8x128xf32> to vector<8x128xbf16>
    %c15 = arith.constant 15 : index
    %c0_126 = arith.constant 0 : index
    %c0_127 = arith.constant 0 : index
    %235 = vector.load %arg3[%c15, %c0_126, %c0_127] : memref<19x256x256xbf16, #tpu.memory_space<vmem>>, vector<1x128x256xbf16>
    %236 = vector.shape_cast %235 : vector<1x128x256xbf16> to vector<128x256xbf16>
    %cst_128 = arith.constant dense<0.000000e+00> : vector<8x256xf32>
    %237 = tpu.matmul %234, %236, %cst_128 {dimension_numbers = #tpu.dot_dimension_numbers<[1], [0], [0], [1], [0, 0, 1, 1], [], []>} : vector<8x128xbf16>, vector<128x256xbf16>, vector<8x256xf32> -> vector<8x256xf32>
    %c15_129 = arith.constant 15 : index
    %c0_130 = arith.constant 0 : index
    %c0_131 = arith.constant 0 : index
    %238 = vector.load %arg4[%c15_129, %c0_130, %c0_131] : memref<19x1x256xf32, #tpu.memory_space<vmem>>, vector<1x1x256xf32>
    %239 = vector.shape_cast %238 : vector<1x1x256xf32> to vector<1x256xf32>
    %240 = vector.broadcast %239 : vector<1x256xf32> to vector<8x256xf32>
    %241 = arith.addf %237, %240 : vector<8x256xf32>
    %242 = vector.extract_strided_slice %241 {offsets = [0, 0], sizes = [8, 128], strides = [1, 1]} : vector<8x256xf32> to vector<8x128xf32>
    %243 = vector.extract_strided_slice %241 {offsets = [0, 128], sizes = [8, 128], strides = [1, 1]} : vector<8x256xf32> to vector<8x128xf32>
    %cst_132 = arith.constant 0.333333343 : f32
    %244 = vector.broadcast %cst_132 : f32 to vector<8x128xf32>
    %245 = arith.mulf %243, %244 : vector<8x128xf32>
    %246 = math.tanh %245 : vector<8x128xf32>
    %cst_133 = arith.constant 3.000000e+00 : f32
    %247 = vector.broadcast %cst_133 : f32 to vector<8x128xf32>
    %248 = arith.mulf %247, %246 : vector<8x128xf32>
    %249 = math.exp %248 : vector<8x128xf32>
    %250 = arith.mulf %197, %249 : vector<8x128xf32>
    %251 = arith.addf %250, %242 : vector<8x128xf32>
    %252 = arith.addf %198, %248 : vector<8x128xf32>
    %253 = arith.truncf %251 : vector<8x128xf32> to vector<8x128xbf16>
    %254 = tpu.concatenate %253, %142 in 1 : vector<8x128xbf16>, vector<8x128xbf16> -> vector<8x256xbf16>
    %c16 = arith.constant 16 : index
    %c0_134 = arith.constant 0 : index
    %c0_135 = arith.constant 0 : index
    %255 = vector.load %arg3[%c16, %c0_134, %c0_135] : memref<19x256x256xbf16, #tpu.memory_space<vmem>>, vector<1x256x128xbf16>
    %256 = vector.shape_cast %255 : vector<1x256x128xbf16> to vector<256x128xbf16>
    %cst_136 = arith.constant dense<0.000000e+00> : vector<8x128xf32>
    %257 = tpu.matmul %254, %256, %cst_136 {dimension_numbers = #tpu.dot_dimension_numbers<[1], [0], [0], [1], [0, 0, 1, 1], [], []>} : vector<8x256xbf16>, vector<256x128xbf16>, vector<8x128xf32> -> vector<8x128xf32>
    %c16_137 = arith.constant 16 : index
    %c0_138 = arith.constant 0 : index
    %c0_139 = arith.constant 0 : index
    %258 = vector.load %arg4[%c16_137, %c0_138, %c0_139] : memref<19x1x256xf32, #tpu.memory_space<vmem>>, vector<1x1x256xf32>
    %259 = vector.shape_cast %258 : vector<1x1x256xf32> to vector<1x256xf32>
    %260 = vector.extract_strided_slice %259 {offsets = [0, 0], sizes = [1, 128], strides = [1, 1]} : vector<1x256xf32> to vector<1x128xf32>
    %261 = vector.broadcast %260 : vector<1x128xf32> to vector<8x128xf32>
    %262 = arith.addf %257, %261 : vector<8x128xf32>
    %cst_140 = arith.constant 0.000000e+00 : f32
    %263 = vector.broadcast %cst_140 : f32 to vector<8x128xf32>
    %264 = arith.cmpf ogt, %262, %263 : vector<8x128xf32>
    %cst_141 = arith.constant 0.000000e+00 : f32
    %265 = vector.broadcast %cst_141 : f32 to vector<8x128xf32>
    %266 = arith.minimumf %262, %265 : vector<8x128xf32>
    %267 = math.exp %266 : vector<8x128xf32>
    %cst_142 = arith.constant 1.000000e+00 : f32
    %268 = vector.broadcast %cst_142 : f32 to vector<8x128xf32>
    %269 = arith.subf %267, %268 : vector<8x128xf32>
    %270 = arith.select %264, %262, %269 : vector<8x128xi1>, vector<8x128xf32>
    %c17 = arith.constant 17 : index
    %c0_143 = arith.constant 0 : index
    %c0_144 = arith.constant 0 : index
    %271 = vector.load %arg3[%c17, %c0_143, %c0_144] : memref<19x256x256xbf16, #tpu.memory_space<vmem>>, vector<1x128x128xbf16>
    %272 = vector.shape_cast %271 : vector<1x128x128xbf16> to vector<128x128xbf16>
    %273 = arith.truncf %270 : vector<8x128xf32> to vector<8x128xbf16>
    %cst_145 = arith.constant dense<0.000000e+00> : vector<8x128xf32>
    %274 = tpu.matmul %273, %272, %cst_145 {dimension_numbers = #tpu.dot_dimension_numbers<[1], [0], [0], [1], [0, 0, 1, 1], [], []>} : vector<8x128xbf16>, vector<128x128xbf16>, vector<8x128xf32> -> vector<8x128xf32>
    %c17_146 = arith.constant 17 : index
    %c0_147 = arith.constant 0 : index
    %c0_148 = arith.constant 0 : index
    %275 = vector.load %arg4[%c17_146, %c0_147, %c0_148] : memref<19x1x256xf32, #tpu.memory_space<vmem>>, vector<1x1x256xf32>
    %276 = vector.shape_cast %275 : vector<1x1x256xf32> to vector<1x256xf32>
    %277 = vector.extract_strided_slice %276 {offsets = [0, 0], sizes = [1, 128], strides = [1, 1]} : vector<1x256xf32> to vector<1x128xf32>
    %278 = vector.broadcast %277 : vector<1x128xf32> to vector<8x128xf32>
    %279 = arith.addf %274, %278 : vector<8x128xf32>
    %cst_149 = arith.constant 0.000000e+00 : f32
    %280 = vector.broadcast %cst_149 : f32 to vector<8x128xf32>
    %281 = arith.cmpf ogt, %279, %280 : vector<8x128xf32>
    %cst_150 = arith.constant 0.000000e+00 : f32
    %282 = vector.broadcast %cst_150 : f32 to vector<8x128xf32>
    %283 = arith.minimumf %279, %282 : vector<8x128xf32>
    %284 = math.exp %283 : vector<8x128xf32>
    %cst_151 = arith.constant 1.000000e+00 : f32
    %285 = vector.broadcast %cst_151 : f32 to vector<8x128xf32>
    %286 = arith.subf %284, %285 : vector<8x128xf32>
    %287 = arith.select %281, %279, %286 : vector<8x128xi1>, vector<8x128xf32>
    %288 = arith.truncf %287 : vector<8x128xf32> to vector<8x128xbf16>
    %c18 = arith.constant 18 : index
    %c0_152 = arith.constant 0 : index
    %c0_153 = arith.constant 0 : index
    %289 = vector.load %arg3[%c18, %c0_152, %c0_153] : memref<19x256x256xbf16, #tpu.memory_space<vmem>>, vector<1x128x256xbf16>
    %290 = vector.shape_cast %289 : vector<1x128x256xbf16> to vector<128x256xbf16>
    %cst_154 = arith.constant dense<0.000000e+00> : vector<8x256xf32>
    %291 = tpu.matmul %288, %290, %cst_154 {dimension_numbers = #tpu.dot_dimension_numbers<[1], [0], [0], [1], [0, 0, 1, 1], [], []>} : vector<8x128xbf16>, vector<128x256xbf16>, vector<8x256xf32> -> vector<8x256xf32>
    %c18_155 = arith.constant 18 : index
    %c0_156 = arith.constant 0 : index
    %c0_157 = arith.constant 0 : index
    %292 = vector.load %arg4[%c18_155, %c0_156, %c0_157] : memref<19x1x256xf32, #tpu.memory_space<vmem>>, vector<1x1x256xf32>
    %293 = vector.shape_cast %292 : vector<1x1x256xf32> to vector<1x256xf32>
    %294 = vector.broadcast %293 : vector<1x256xf32> to vector<8x256xf32>
    %295 = arith.addf %291, %294 : vector<8x256xf32>
    %296 = vector.extract_strided_slice %295 {offsets = [0, 0], sizes = [8, 128], strides = [1, 1]} : vector<8x256xf32> to vector<8x128xf32>
    %297 = vector.extract_strided_slice %295 {offsets = [0, 128], sizes = [8, 128], strides = [1, 1]} : vector<8x256xf32> to vector<8x128xf32>
    %cst_158 = arith.constant 0.333333343 : f32
    %298 = vector.broadcast %cst_158 : f32 to vector<8x128xf32>
    %299 = arith.mulf %297, %298 : vector<8x128xf32>
    %300 = math.tanh %299 : vector<8x128xf32>
    %cst_159 = arith.constant 3.000000e+00 : f32
    %301 = vector.broadcast %cst_159 : f32 to vector<8x128xf32>
    %302 = arith.mulf %301, %300 : vector<8x128xf32>
    %303 = math.exp %302 : vector<8x128xf32>
    %304 = arith.mulf %251, %303 : vector<8x128xf32>
    %305 = arith.addf %304, %296 : vector<8x128xf32>
    %306 = arith.addf %252, %302 : vector<8x128xf32>
    %cst_160 = arith.constant 5.000000e-01 : f32
    %307 = vector.broadcast %cst_160 : f32 to vector<8x128xf32>
    %308 = arith.mulf %307, %305 : vector<8x128xf32>
    %309 = arith.mulf %308, %305 : vector<8x128xf32>
    %310 = arith.subf %306, %309 : vector<8x128xf32>
    %cst_161 = arith.constant dense<0.000000e+00> : vector<8xf32>
    %311 = vector.multi_reduction <add>, %310, %cst_161 [1] : vector<8x128xf32> to vector<8xf32>
    %312 = vector.shape_cast %311 : vector<8xf32> to vector<8x1xf32>
    %cst_162 = arith.constant 6.4325695 : f32
    %313 = vector.broadcast %cst_162 : f32 to vector<8x1xf32>
    %314 = arith.subf %312, %313 : vector<8x1xf32>
    %315 = vector.shape_cast %314 : vector<8x1xf32> to vector<8x1xf32>
    %316 = vector.broadcast %315 : vector<8x1xf32> to vector<8x128xf32>
    %c0_163 = arith.constant 0 : index
    %c0_164 = arith.constant 0 : index
    %317 = vector.load %arg5[%c0_163, %c0_164] : memref<8x128xf32, #tpu.memory_space<vmem>>, vector<8x128xf32>
    tpu.vector_store %arg5[%c0_163, %c0_164], %316 {strides = array<i32>} : memref<8x128xf32, #tpu.memory_space<vmem>>, vector<8x128xf32>,
    return
  }
  func.func @transform_0(%arg0: i32) -> (i32, i32) {
    %c0_i32 = arith.constant 0 : i32
    %c0_i32_0 = arith.constant 0 : i32
    return %arg0, %c0_i32 : i32, i32
  }
  func.func @transform_1(%arg0: i32) -> (i32, i32) {
    %c0_i32 = arith.constant 0 : i32
    %c0_i32_0 = arith.constant 0 : i32
    return %arg0, %c0_i32 : i32, i32
  }
  func.func @transform_2(%arg0: i32) -> (i32, i32, i32) {
    %c0_i32 = arith.constant 0 : i32
    %c0_i32_0 = arith.constant 0 : i32
    %c0_i32_1 = arith.constant 0 : i32
    %c0_i32_2 = arith.constant 0 : i32
    return %c0_i32, %c0_i32_0, %c0_i32_1 : i32, i32, i32
  }
  func.func @transform_3(%arg0: i32) -> (i32, i32, i32) {
    %c0_i32 = arith.constant 0 : i32
    %c0_i32_0 = arith.constant 0 : i32
    %c0_i32_1 = arith.constant 0 : i32
    %c0_i32_2 = arith.constant 0 : i32
    return %c0_i32, %c0_i32_0, %c0_i32_1 : i32, i32, i32
  }
  func.func @transform_4(%arg0: i32) -> (i32, i32) {
    %c0_i32 = arith.constant 0 : i32
    %c0_i32_0 = arith.constant 0 : i32
    return %arg0, %c0_i32 : i32, i32
  }
}

</mosaic_0001>

<bundles_post_ra>
// kernel: npe_with_embedding_forward.1
= control target key start
LH: loop header
LB: loop body
LE: loop exit
PB: predicated region body
PF: predicated region fallthrough
CT: control target
= control target key end

     0   :  { %v3874_v0 = vmov 0.0   ;;  %vm3875_vm0 = vmmov 0   ;;  %v38_v21 = vlaneseq  ;;  %s4774_s2 = inlined_call_operand.vmem [shape: bf16[19,256,256], index: 2, kind: input, shape index: {}]   ;;  %s4775_s1 = inlined_call_operand.vmem [shape: f32[8,128], index: 1, kind: input, shape index: {}]   ;;  %s4776_s3 = inlined_call_operand.vmem [shape: f32[19,1,256], index: 3, kind: input, shape index: {}]   ;;  %s4777_s0 = inlined_call_operand.vmem [shape: f32[8,128], index: 0, kind: input, shape index: {}]   ;;  %s4778_s4 = inlined_call_operand.vmem [shape: f32[8,128], index: 4, kind: output, shape index: {}]  }
   0x1   :  { %3351 = vmatprep.subr.bf16.mxu0 %v3874_v0  ;;  %v3614_v1 = vld [vmem:[%s4774_s2] ss:$8 sps:$4 sm:$0xff]   ;;  %3367 = vmatprep.mubr.msk.bf16.mxu0 %vm3875_vm0, %v3874_v0  ;;  %v3615_v2 = vld [vmem:[%s4774_s2 + $0x10] ss:$8 sps:$4 sm:$0xff]  }
   0x2   :  { %3371 = vmatprep.subr.bf16.mxu1 %v3874_v0  ;;  %3387 = vmatprep.mubr.msk.bf16.mxu1 %vm3875_vm0, %v3874_v0  ;;  %v3616_v3 = vld [vmem:[%s4774_s2 + $0x20] ss:$8 sps:$4 sm:$0xff]   ;;  %v3617_v5 = vld [vmem:[%s4774_s2 + $0x30] ss:$8 sps:$4 sm:$0xff]   ;;  %v3989_v22 = vshrl.u32 %v38_v21, 7 }
   0x3   :  { %3352 = vmatpush3.bf16.msra.mxu0 %v3614_v1  ;;  %v3622_v4 = vld [vmem:[%s4774_s2 + $0x100] ss:$8 sps:$4 sm:$0xff]   ;;  %v3623_v6 = vld [vmem:[%s4774_s2 + $0x110] ss:$8 sps:$4 sm:$0xff]  }
   0x4   :  { %3353 = vmatprep.subr.bf16.mxu0 %v3874_v0  ;;  %3372 = vmatpush3.bf16.msra.mxu1 %v3622_v4  ;;  %v3618_v7 = vld [vmem:[%s4774_s2 + $0x40] ss:$8 sps:$4 sm:$0xff]   ;;  %v3619_v8 = vld [vmem:[%s4774_s2 + $0x50] ss:$8 sps:$4 sm:$0xff]   ;;  %v3992_v23 = vsub.s32 0, %v3989_v22 }
   0x5   :  { %3373 = vmatprep.subr.bf16.mxu1 %v3874_v0  ;;  %v3620_v9 = vld [vmem:[%s4774_s2 + $0x60] ss:$8 sps:$4 sm:$0xff]   ;;  %v3621_v10 = vld [vmem:[%s4774_s2 + $0x70] ss:$8 sps:$4 sm:$0xff]  }
   0x6   :  { %v3949_v11 = vld [vmem:[%s4775_s1] sm:$0xff]  ;;  %v3625_v14 = vld [vmem:[%s4774_s2 + $0x130] ss:$8 sps:$4 sm:$0xff]  }
   0x7   :  { %3354 = vmatpush3.bf16.msra.mxu0 %v3615_v2  ;;  %v35_v12 = vpack.c.bf16 %v3949_v11, %v3949_v11  ;;  %v3624_v13 = vld [vmem:[%s4774_s2 + $0x120] ss:$8 sps:$4 sm:$0xff]   ;;  %v3627_v16 = vld [vmem:[%s4774_s2 + $0x150] ss:$8 sps:$4 sm:$0xff]  }
   0x8   :  { %3355 = vmatprep.subr.bf16.mxu0 %v3874_v0  ;;  %3374 = vmatpush3.bf16.msra.mxu1 %v3623_v6  ;;  %v3626_v15 = vld [vmem:[%s4774_s2 + $0x140] ss:$8 sps:$4 sm:$0xff]   ;;  %v3629_v18 = vld [vmem:[%s4774_s2 + $0x170] ss:$8 sps:$4 sm:$0xff]  }
   0x9   :  { %3375 = vmatprep.subr.bf16.mxu1 %v3874_v0  ;;  %v3628_v17 = vld [vmem:[%s4774_s2 + $0x160] ss:$8 sps:$4 sm:$0xff]   ;;  %v3631_v20 = vld [vmem:[%s4774_s2 + $0x210] ss:$8 sps:$4 sm:$0xff]  }
   0xa   :  { %v3630_v19 = vld [vmem:[%s4774_s2 + $0x200] ss:$8 sps:$4 sm:$0xff]   ;;  %v3633_v38 = vld [vmem:[%s4774_s2 + $0x230] ss:$8 sps:$4 sm:$0xff]  }
   0xb   :  { %3356 = vmatpush3.bf16.msra.mxu0 %v3616_v3  ;;  %v36_v24 = vld [vmem:[%s4776_s3] sm:$0x3]  ;;  %v3635_v40 = vld [vmem:[%s4774_s2 + $0x250] ss:$8 sps:$4 sm:$0xff]   ;;  %v2626_v49 = vld [vmem:[%s4776_s3 + $0x2] sm:$0x3] }
   0xc   :  { %3357 = vmatprep.subr.bf16.mxu0 %v3874_v0  ;;  %3376 = vmatpush3.bf16.msra.mxu1 %v3624_v13  ;;  %v41_v25 = vrot.slane %v36_v24, %v3992_v23  ;;  %v3632_v37 = vld [vmem:[%s4774_s2 + $0x220] ss:$8 sps:$4 sm:$0xff]   ;;  %v3637_v42 = vld [vmem:[%s4774_s2 + $0x270] ss:$8 sps:$4 sm:$0xff]   ;;  %v161_v50 = vrot.slane %v2626_v49, %v3992_v23  ;;  %v2652_v3 = vld [vmem:[%s4776_s3 + $0x4] sm:$0x3] }
   0xd   :  { %3377 = vmatprep.subr.bf16.mxu1 %v3874_v0  ;;  %v3634_v39 = vld [vmem:[%s4774_s2 + $0x240] ss:$8 sps:$4 sm:$0xff]   ;;  %v3639_v44 = vld [vmem:[%s4774_s2 + $0x310] ss:$8 sps:$4 sm:$0xff]   ;;  %v281_v4 = vrot.slane %v2652_v3, %v3992_v23 }
   0xe   :  { %v3636_v41 = vld [vmem:[%s4774_s2 + $0x260] ss:$8 sps:$4 sm:$0xff]   ;;  %v3641_v46 = vld [vmem:[%s4774_s2 + $0x330] ss:$8 sps:$4 sm:$0xff]  }
   0xf   :  { %3358 = vmatpush3.bf16.msra.mxu0 %v3617_v5  ;;  %v3638_v43 = vld [vmem:[%s4774_s2 + $0x300] ss:$8 sps:$4 sm:$0xff]   ;;  %v3643_v48 = vld [vmem:[%s4774_s2 + $0x350] ss:$8 sps:$4 sm:$0xff]  }
  0x10   :  { %3359 = vmatprep.subr.bf16.mxu0 %v3874_v0  ;;  %3378 = vmatpush3.bf16.msra.mxu1 %v3625_v14  ;;  %v3640_v45 = vld [vmem:[%s4774_s2 + $0x320] ss:$8 sps:$4 sm:$0xff]   ;;  %v3645_v63 = vld [vmem:[%s4774_s2 + $0x370] ss:$8 sps:$4 sm:$0xff]  }
  0x11   :  { %3379 = vmatprep.subr.bf16.mxu1 %v3874_v0  ;;  %v3642_v47 = vld [vmem:[%s4774_s2 + $0x340] ss:$8 sps:$4 sm:$0xff]   ;;  %v3647_v2 = vld [vmem:[%s4774_s2 + $0x410] ss:$8 sps:$4 sm:$0xff]  }
  0x12   :  { %v3644_v62 = vld [vmem:[%s4774_s2 + $0x360] ss:$8 sps:$4 sm:$0xff]  }
  0x13   :  { %3360 = vmatpush3.bf16.msra.mxu0 %v3618_v7  ;;  %v3646_v1 = vld [vmem:[%s4774_s2 + $0x400] ss:$8 sps:$4 sm:$0xff]  }
  0x14   :  { %3361 = vmatprep.subr.bf16.mxu0 %v3874_v0  ;;  %3380 = vmatpush3.bf16.msra.mxu1 %v3626_v15  ;;  %v3648_v13 = vld [vmem:[%s4774_s2 + $0x420] ss:$8 sps:$4 sm:$0xff]   ;;  %v3651_v15 = vld [vmem:[%s4774_s2 + $0x450] ss:$8 sps:$4 sm:$0xff]  }
  0x15   :  { %3381 = vmatprep.subr.bf16.mxu1 %v3874_v0  ;;  %v3650_v14 = vld [vmem:[%s4774_s2 + $0x440] ss:$8 sps:$4 sm:$0xff]  }
  0x16   :  { %v3674_v3 = vld [vmem:[%s4774_s2 + $0x740] ss:$8 sps:$4 sm:$0xff]  }
  0x17   :  { %3362 = vmatpush3.bf16.msra.mxu0 %v3619_v8 }
  0x18   :  { %3363 = vmatprep.subr.bf16.mxu0 %v3874_v0  ;;  %3382 = vmatpush3.bf16.msra.mxu1 %v3627_v16  ;;  %v3652_v16 = vld [vmem:[%s4774_s2 + $0x460] ss:$8 sps:$4 sm:$0xff]  }
  0x19   :  { %3383 = vmatprep.subr.bf16.mxu1 %v3874_v0 }
  0x1b   :  { %3364 = vmatpush3.bf16.msra.mxu0 %v3620_v9 }
  0x1c   :  { %3365 = vmatprep.subr.bf16.mxu0 %v3874_v0  ;;  %3384 = vmatpush3.bf16.msra.mxu1 %v3628_v17  ;;  %v3653_v17 = vld [vmem:[%s4774_s2 + $0x470] ss:$8 sps:$4 sm:$0xff]  }
  0x1d   :  { %3385 = vmatprep.subr.bf16.mxu1 %v3874_v0 }
  0x1f   :  { %3366 = vmatpush3.bf16.msra.mxu0 %v3621_v10 }
  0x20   :  { %3391 = vmatprep.subr.bf16.mxu0 %v3874_v0  ;;  %3386 = vmatpush3.bf16.msra.mxu1 %v3629_v18  ;;  %v3654_v18 = vld [vmem:[%s4774_s2 + $0x500] ss:$8 sps:$4 sm:$0xff]  }
  0x21   :  { %3411 = vmatprep.subr.bf16.mxu1 %v3874_v0 }
  0x22   :  { %3368 = vmatmul.mubr.bf16.vlgmr.msra.gmra.mrb[0].mxu0 %v35_v12 }
  0x23   :  { %3407 = vmatprep.mubr.msk.bf16.mxu0 %vm3875_vm0, %v3874_v0  ;;  %3392 = vmatpush3.bf16.msra.mxu0 %v3630_v19  ;;  %v3655_v19 = vld [vmem:[%s4774_s2 + $0x510] ss:$8 sps:$4 sm:$0xff]  }
  0x24   :  { %3393 = vmatprep.subr.bf16.mxu0 %v3874_v0 }
  0x27   :  { %3394 = vmatpush3.bf16.msra.mxu0 %v3631_v20  ;;  %v2677_v20 = vld [vmem:[%s4776_s3 + $0x6] sm:$0x3] }
  0x28   :  { %3395 = vmatprep.subr.bf16.mxu0 %v3874_v0  ;;  %v396_v21 = vrot.slane %v2677_v20, %v3992_v23 }
  0x2b   :  { %3396 = vmatpush3.bf16.msra.mxu0 %v3632_v37  ;;  %v3658_v37 = vld [vmem:[%s4774_s2 + $0x540] ss:$8 sps:$4 sm:$0xff]  }
  0x2c   :  { %3397 = vmatprep.subr.bf16.mxu0 %v3874_v0 }
  0x2f   :  { %3398 = vmatpush3.bf16.msra.mxu0 %v3633_v38  ;;  %v3659_v38 = vld [vmem:[%s4774_s2 + $0x550] ss:$8 sps:$4 sm:$0xff]  }
  0x30   :  { %3399 = vmatprep.subr.bf16.mxu0 %v3874_v0 }
  0x33   :  { %3400 = vmatpush3.bf16.msra.mxu0 %v3634_v39  ;;  %v3660_v39 = vld [vmem:[%s4774_s2 + $0x560] ss:$8 sps:$4 sm:$0xff]  }
  0x34   :  { %3401 = vmatprep.subr.bf16.mxu0 %v3874_v0 }
  0x37   :  { %3402 = vmatpush3.bf16.msra.mxu0 %v3635_v40  ;;  %v3661_v40 = vld [vmem:[%s4774_s2 + $0x570] ss:$8 sps:$4 sm:$0xff]  }
  0x38   :  { %3403 = vmatprep.subr.bf16.mxu0 %v3874_v0 }
  0x3b   :  { %3404 = vmatpush3.bf16.msra.mxu0 %v3636_v41  ;;  %v3662_v41 = vld [vmem:[%s4774_s2 + $0x600] ss:$8 sps:$4 sm:$0xff]  }
  0x3c   :  { %3405 = vmatprep.subr.bf16.mxu0 %v3874_v0 }
  0x3f   :  { %3406 = vmatpush3.bf16.msra.mxu0 %v3637_v42  ;;  %v3663_v42 = vld [vmem:[%s4774_s2 + $0x610] ss:$8 sps:$4 sm:$0xff]  }
  0x40   :  { %3431 = vmatprep.subr.bf16.mxu0 %v3874_v0 }
  0xf5   :  { %v125_v26 = vpop.f32.mrb[0].mxu0 }
  0xf6   :  { %v126_v27 = vadd.f32 %v125_v26, %v41_v25  ;;  %v3369_v28 = vpop.f32.mrb[1].mxu0 }
  0xf7   :  { %v128_v29 = vpop.f32.mrb[2].mxu0 }
  0xf8   :  { %v132_v30 = vmin.f32 %v126_v27, 0.0  ;;  %v3370_v31 = vpop.f32.mrb[3].mxu0  ;;  %vm131_vm1 = vcmp.gt.f32.partialorder %v126_v27, 0.0 }
  0xfa   :  { %v133_v32 = vmul.f32 1.442695, %v132_v30 }
  0xfc   :  { %3838 = vpow2.f32 %v133_v32 }
 0x106   :  { %v3839_v33 = vpop.eup %3838 }
 0x107   :  { %v2609_v34 = vadd.f32 -1.0, %v3839_v33 }
 0x109   :  { %v136_v35 = vsel %vm131_vm1, %v126_v27, %v2609_v34 }
 0x10a   :  { %v154_v36 = vpack.c.bf16 %v136_v35, %v136_v35  ;;  %v3656_v35 = vld [vmem:[%s4774_s2 + $0x520] ss:$8 sps:$4 sm:$0xff]  }
 0x10c   :  { %3388 = vmatmul.mubr.bf16.vlgmr.msra.gmra.mrb[0].mxu1 %v154_v36  ;;  %v3657_v36 = vld [vmem:[%s4774_s2 + $0x530] ss:$8 sps:$4 sm:$0xff]  }
 0x10d   :  { %3427 = vmatprep.mubr.msk.bf16.mxu1 %vm3875_vm0, %v3874_v0  ;;  %3412 = vmatpush3.bf16.msra.mxu1 %v3638_v43  ;;  %v3664_v43 = vld [vmem:[%s4774_s2 + $0x620] ss:$8 sps:$4 sm:$0xff]  }
 0x10e   :  { %3413 = vmatprep.subr.bf16.mxu1 %v3874_v0 }
 0x111   :  { %3414 = vmatpush3.bf16.msra.mxu1 %v3639_v44  ;;  %v3665_v44 = vld [vmem:[%s4774_s2 + $0x630] ss:$8 sps:$4 sm:$0xff]  }
 0x112   :  { %3415 = vmatprep.subr.bf16.mxu1 %v3874_v0 }
 0x115   :  { %3416 = vmatpush3.bf16.msra.mxu1 %v3640_v45  ;;  %v3666_v45 = vld [vmem:[%s4774_s2 + $0x640] ss:$8 sps:$4 sm:$0xff]  }
 0x116   :  { %3417 = vmatprep.subr.bf16.mxu1 %v3874_v0 }
 0x119   :  { %3418 = vmatpush3.bf16.msra.mxu1 %v3641_v46  ;;  %v3667_v46 = vld [vmem:[%s4774_s2 + $0x650] ss:$8 sps:$4 sm:$0xff]  }
 0x11a   :  { %3419 = vmatprep.subr.bf16.mxu1 %v3874_v0 }
 0x11d   :  { %3420 = vmatpush3.bf16.msra.mxu1 %v3642_v47  ;;  %v2703_v47 = vld [vmem:[%s4776_s3 + $0x8] sm:$0x3] }
 0x11e   :  { %3421 = vmatprep.subr.bf16.mxu1 %v3874_v0 }
 0x121   :  { %3422 = vmatpush3.bf16.msra.mxu1 %v3643_v48  ;;  %v516_v48 = vrot.slane %v2703_v47, %v3992_v23 }
 0x122   :  { %3423 = vmatprep.subr.bf16.mxu1 %v3874_v0 }
 0x125   :  { %3424 = vmatpush3.bf16.msra.mxu1 %v3644_v62  ;;  %v3670_v62 = vld [vmem:[%s4774_s2 + $0x700] ss:$8 sps:$4 sm:$0xff]  }
 0x126   :  { %3425 = vmatprep.subr.bf16.mxu1 %v3874_v0 }
 0x129   :  { %3426 = vmatpush3.bf16.msra.mxu1 %v3645_v63  ;;  %v3671_v63 = vld [vmem:[%s4774_s2 + $0x710] ss:$8 sps:$4 sm:$0xff]  }
 0x12a   :  { %3451 = vmatprep.subr.bf16.mxu1 %v3874_v0 }
 0x1df   :  { %v245_v51 = vpop.f32.mrb[0].mxu1 }
 0x1e0   :  { %v246_v52 = vadd.f32 %v245_v51, %v161_v50  ;;  %v3389_v53 = vpop.f32.mrb[1].mxu1 }
 0x1e1   :  { %v248_v54 = vpop.f32.mrb[2].mxu1 }
 0x1e2   :  { %v252_v55 = vmin.f32 %v246_v52, 0.0  ;;  %v3390_v56 = vpop.f32.mrb[3].mxu1  ;;  %vm251_vm2 = vcmp.gt.f32.partialorder %v246_v52, 0.0 }
 0x1e4   :  { %v253_v57 = vmul.f32 1.442695, %v252_v55 }
 0x1e6   :  { %3840 = vpow2.f32 %v253_v57 }
 0x1f0   :  { %v3841_v58 = vpop.eup %3840 }
 0x1f1   :  { %v2635_v59 = vadd.f32 -1.0, %v3841_v58 }
 0x1f3   :  { %v256_v60 = vsel %vm251_vm2, %v246_v52, %v2635_v59 }
 0x1f4   :  { %v274_v61 = vpack.c.bf16 %v256_v60, %v256_v60  ;;  %v3668_v60 = vld [vmem:[%s4774_s2 + $0x660] ss:$8 sps:$4 sm:$0xff]  }
 0x1f6   :  { %3408 = vmatmul.mubr.bf16.vlgmr.msra.gmra.mrb[4].mxu0 %v274_v61  ;;  %v3669_v61 = vld [vmem:[%s4774_s2 + $0x670] ss:$8 sps:$4 sm:$0xff]  }
 0x1f7   :  { %3447 = vmatprep.mubr.msk.bf16.mxu0 %vm3875_vm0, %v3874_v0  ;;  %3432 = vmatpush3.bf16.msra.mxu0 %v3646_v1  ;;  %v3672_v1 = vld [vmem:[%s4774_s2 + $0x720] ss:$8 sps:$4 sm:$0xff]  }
 0x1f8   :  { %3433 = vmatprep.subr.bf16.mxu0 %v3874_v0 }
 0x1fb   :  { %3434 = vmatpush3.bf16.msra.mxu0 %v3647_v2  ;;  %v3673_v2 = vld [vmem:[%s4774_s2 + $0x730] ss:$8 sps:$4 sm:$0xff]  }
 0x1fc   :  { %3435 = vmatprep.subr.bf16.mxu0 %v3874_v0 }
 0x1ff   :  { %3436 = vmatpush3.bf16.msra.mxu0 %v3648_v13 }
 0x200   :  { %3437 = vmatprep.subr.bf16.mxu0 %v3874_v0 }
 0x2c9   :  { %v365_v5 = vpop.f32.mrb[4].mxu0 }
 0x2ca   :  { %v366_v6 = vadd.f32 %v365_v5, %v281_v4  ;;  %v3409_v7 = vpop.f32.mrb[5].mxu0  ;;  %v3675_v4 = vld [vmem:[%s4774_s2 + $0x750] ss:$8 sps:$4 sm:$0xff]   ;;  %v3676_v5 = vld [vmem:[%s4774_s2 + $0x760] ss:$8 sps:$4 sm:$0xff]  }
 0x2cb   :  { %v368_v8 = vpop.f32.mrb[6].mxu0 }
 0x2cc   :  { %v4075_v9 = vadd.f32 %v366_v6, %v3949_v11  ;;  %v3410_v10 = vpop.f32.mrb[7].mxu0  ;;  %v3649_v11 = vld [vmem:[%s4774_s2 + $0x430] ss:$8 sps:$4 sm:$0xff]   ;;  %v2729_v6 = vld [vmem:[%s4776_s3 + $0xa] sm:$0x3] }
 0x2cd   :  { %3438 = vmatpush3.bf16.msra.mxu0 %v3649_v11  ;;  %v636_v7 = vrot.slane %v2729_v6, %v3992_v23 }
 0x2ce   :  { %v389_v12 = vpack.c.bf16 %v4075_v9, %v4075_v9  ;;  %3439 = vmatprep.subr.bf16.mxu0 %v3874_v0 }
 0x2d0   :  { %3428 = vmatmul.mubr.bf16.vlgmr.msra.gmra.mrb[4].mxu1 %v389_v12 }
 0x2d1   :  { %3467 = vmatprep.mubr.msk.bf16.mxu1 %vm3875_vm0, %v3874_v0  ;;  %3440 = vmatpush3.bf16.msra.mxu0 %v3650_v14 }
 0x2d2   :  { %3441 = vmatprep.subr.bf16.mxu0 %v3874_v0  ;;  %3452 = vmatpush3.bf16.msra.mxu1 %v3654_v18  ;;  %v2754_v18 = vld [vmem:[%s4776_s3 + $0xc] sm:$0x3] }
 0x2d3   :  { %3453 = vmatprep.subr.bf16.mxu1 %v3874_v0 }
 0x2d5   :  { %3442 = vmatpush3.bf16.msra.mxu0 %v3651_v15 }
 0x2d6   :  { %3443 = vmatprep.subr.bf16.mxu0 %v3874_v0  ;;  %3454 = vmatpush3.bf16.msra.mxu1 %v3655_v19  ;;  %v751_v19 = vrot.slane %v2754_v18, %v3992_v23  ;;  %v3707_v18 = vld [vmem:[%s4774_s2 + $0xa60] ss:$8 sps:$4 sm:$0xff]  }
 0x2d7   :  { %3455 = vmatprep.subr.bf16.mxu1 %v3874_v0 }
 0x2d9   :  { %3444 = vmatpush3.bf16.msra.mxu0 %v3652_v16  ;;  %v3677_v16 = vld [vmem:[%s4774_s2 + $0x770] ss:$8 sps:$4 sm:$0xff]  }
 0x2da   :  { %3445 = vmatprep.subr.bf16.mxu0 %v3874_v0  ;;  %3456 = vmatpush3.bf16.msra.mxu1 %v3656_v35  ;;  %v3687_v35 = vld [vmem:[%s4774_s2 + $0x910] ss:$8 sps:$4 sm:$0xff]  }
 0x2db   :  { %3457 = vmatprep.subr.bf16.mxu1 %v3874_v0 }
 0x2dd   :  { %3446 = vmatpush3.bf16.msra.mxu0 %v3653_v17  ;;  %v3678_v17 = vld [vmem:[%s4774_s2 + $0x800] ss:$8 sps:$4 sm:$0xff]  }
 0x2de   :  { %3471 = vmatprep.subr.bf16.mxu0 %v3874_v0  ;;  %3458 = vmatpush3.bf16.msra.mxu1 %v3657_v36  ;;  %v2779_v36 = vld [vmem:[%s4776_s3 + $0xe] sm:$0x3] }
 0x2df   :  { %3459 = vmatprep.subr.bf16.mxu1 %v3874_v0 }
 0x2e2   :  { %3460 = vmatpush3.bf16.msra.mxu1 %v3658_v37  ;;  %v865_v37 = vrot.slane %v2779_v36, %v3992_v23 }
 0x2e3   :  { %3461 = vmatprep.subr.bf16.mxu1 %v3874_v0 }
 0x2e6   :  { %3462 = vmatpush3.bf16.msra.mxu1 %v3659_v38 }
 0x2e7   :  { %3463 = vmatprep.subr.bf16.mxu1 %v3874_v0 }
 0x2ea   :  { %3464 = vmatpush3.bf16.msra.mxu1 %v3660_v39 }
 0x2eb   :  { %3465 = vmatprep.subr.bf16.mxu1 %v3874_v0 }
 0x2ee   :  { %3466 = vmatpush3.bf16.msra.mxu1 %v3661_v40 }
 0x2ef   :  { %3491 = vmatprep.subr.bf16.mxu1 %v3874_v0 }
 0x3a3   :  { %v480_v24 = vpop.f32.mrb[4].mxu1 }
 0x3a4   :  { %v481_v25 = vadd.f32 %v480_v24, %v396_v21  ;;  %v3429_v26 = vpop.f32.mrb[5].mxu1 }
 0x3a5   :  { %v483_v27 = vpop.f32.mrb[6].mxu1 }
 0x3a6   :  { %v487_v28 = vmin.f32 %v481_v25, 0.0  ;;  %v3430_v29 = vpop.f32.mrb[7].mxu1  ;;  %vm486_vm3 = vcmp.gt.f32.partialorder %v481_v25, 0.0 }
 0x3a7   :  { %v3681_v29 = vld [vmem:[%s4774_s2 + $0x830] ss:$8 sps:$4 sm:$0xff]  }
 0x3a8   :  { %v488_v30 = vmul.f32 1.442695, %v487_v28  ;;  %v3680_v28 = vld [vmem:[%s4774_s2 + $0x820] ss:$8 sps:$4 sm:$0xff]  }
 0x3aa   :  { %3842 = vpow2.f32 %v488_v30  ;;  %v3682_v30 = vld [vmem:[%s4774_s2 + $0x840] ss:$8 sps:$4 sm:$0xff]  }
 0x3b4   :  { %v3843_v31 = vpop.eup %3842 }
 0x3b5   :  { %v2686_v32 = vadd.f32 -1.0, %v3843_v31  ;;  %v3683_v31 = vld [vmem:[%s4774_s2 + $0x850] ss:$8 sps:$4 sm:$0xff]  }
 0x3b7   :  { %v491_v33 = vsel %vm486_vm3, %v481_v25, %v2686_v32  ;;  %v3684_v32 = vld [vmem:[%s4774_s2 + $0x860] ss:$8 sps:$4 sm:$0xff]  }
 0x3b8   :  { %v509_v34 = vpack.c.bf16 %v491_v33, %v491_v33  ;;  %v3685_v33 = vld [vmem:[%s4774_s2 + $0x870] ss:$8 sps:$4 sm:$0xff]  }
 0x3ba   :  { %3448 = vmatmul.mubr.bf16.vlgmr.msra.gmra.mrb[8].mxu0 %v509_v34  ;;  %v3686_v34 = vld [vmem:[%s4774_s2 + $0x900] ss:$8 sps:$4 sm:$0xff]  }
 0x3bb   :  { %3487 = vmatprep.mubr.msk.bf16.mxu0 %vm3875_vm0, %v3874_v0  ;;  %3472 = vmatpush3.bf16.msra.mxu0 %v3662_v41 }
 0x3bc   :  { %3473 = vmatprep.subr.bf16.mxu0 %v3874_v0 }
 0x3bf   :  { %3474 = vmatpush3.bf16.msra.mxu0 %v3663_v42 }
 0x3c0   :  { %3475 = vmatprep.subr.bf16.mxu0 %v3874_v0 }
 0x3c3   :  { %3476 = vmatpush3.bf16.msra.mxu0 %v3664_v43 }
 0x3c4   :  { %3477 = vmatprep.subr.bf16.mxu0 %v3874_v0 }
 0x3c7   :  { %3478 = vmatpush3.bf16.msra.mxu0 %v3665_v44 }
 0x3c8   :  { %3479 = vmatprep.subr.bf16.mxu0 %v3874_v0 }
 0x3cb   :  { %3480 = vmatpush3.bf16.msra.mxu0 %v3666_v45 }
 0x3cc   :  { %3481 = vmatprep.subr.bf16.mxu0 %v3874_v0 }
 0x3cf   :  { %3482 = vmatpush3.bf16.msra.mxu0 %v3667_v46 }
 0x3d0   :  { %3483 = vmatprep.subr.bf16.mxu0 %v3874_v0 }
 0x3d3   :  { %3484 = vmatpush3.bf16.msra.mxu0 %v3668_v60  ;;  %v3699_v60 = vld [vmem:[%s4774_s2 + $0xa20] ss:$8 sps:$4 sm:$0xff]  }
 0x3d4   :  { %3485 = vmatprep.subr.bf16.mxu0 %v3874_v0 }
 0x3d7   :  { %3486 = vmatpush3.bf16.msra.mxu0 %v3669_v61  ;;  %v3700_v61 = vld [vmem:[%s4774_s2 + $0xab0] ss:$8 sps:$4 sm:$0xff]  }
 0x3d8   :  { %3511 = vmatprep.subr.bf16.mxu0 %v3874_v0 }
 0x48d   :  { %v600_v49 = vpop.f32.mrb[8].mxu0 }
 0x48e   :  { %v601_v50 = vadd.f32 %v600_v49, %v516_v48  ;;  %v3449_v51 = vpop.f32.mrb[9].mxu0  ;;  %v3688_v49 = vld [vmem:[%s4774_s2 + $0x920] ss:$8 sps:$4 sm:$0xff]  }
 0x48f   :  { %v603_v52 = vpop.f32.mrb[10].mxu0  ;;  %v3690_v51 = vld [vmem:[%s4774_s2 + $0x940] ss:$8 sps:$4 sm:$0xff]  }
 0x490   :  { %v607_v53 = vmin.f32 %v601_v50, 0.0  ;;  %v3450_v54 = vpop.f32.mrb[11].mxu0  ;;  %vm606_vm4 = vcmp.gt.f32.partialorder %v601_v50, 0.0  ;;  %v3691_v52 = vld [vmem:[%s4774_s2 + $0x950] ss:$8 sps:$4 sm:$0xff]  }
 0x491   :  { %v3693_v54 = vld [vmem:[%s4774_s2 + $0x970] ss:$8 sps:$4 sm:$0xff]  }
 0x492   :  { %v608_v55 = vmul.f32 1.442695, %v607_v53  ;;  %v3692_v53 = vld [vmem:[%s4774_s2 + $0x960] ss:$8 sps:$4 sm:$0xff]  }
 0x494   :  { %3844 = vpow2.f32 %v608_v55  ;;  %v3694_v55 = vld [vmem:[%s4774_s2 + $0xa80] ss:$8 sps:$4 sm:$0xff]  }
 0x49e   :  { %v3845_v56 = vpop.eup %3844 }
 0x49f   :  { %v2712_v57 = vadd.f32 -1.0, %v3845_v56  ;;  %v3695_v56 = vld [vmem:[%s4774_s2 + $0xa00] ss:$8 sps:$4 sm:$0xff]  }
 0x4a1   :  { %v611_v58 = vsel %vm606_vm4, %v601_v50, %v2712_v57  ;;  %v3689_v50 = vld [vmem:[%s4774_s2 + $0x930] ss:$8 sps:$4 sm:$0xff]  }
 0x4a2   :  { %v629_v59 = vpack.c.bf16 %v611_v58, %v611_v58  ;;  %v3696_v57 = vld [vmem:[%s4774_s2 + $0xa90] ss:$8 sps:$4 sm:$0xff]  }
 0x4a3   :  { %v3697_v58 = vld [vmem:[%s4774_s2 + $0xa10] ss:$8 sps:$4 sm:$0xff]  }
 0x4a4   :  { %3468 = vmatmul.mubr.bf16.vlgmr.msra.gmra.mrb[8].mxu1 %v629_v59  ;;  %v3698_v59 = vld [vmem:[%s4774_s2 + $0xaa0] ss:$8 sps:$4 sm:$0xff]  }
 0x4a5   :  { %3507 = vmatprep.mubr.msk.bf16.mxu1 %vm3875_vm0, %v3874_v0  ;;  %3492 = vmatpush3.bf16.msra.mxu1 %v3670_v62  ;;  %v3701_v62 = vld [vmem:[%s4774_s2 + $0xa30] ss:$8 sps:$4 sm:$0xff]  }
 0x4a6   :  { %3493 = vmatprep.subr.bf16.mxu1 %v3874_v0 }
 0x4a9   :  { %3494 = vmatpush3.bf16.msra.mxu1 %v3671_v63  ;;  %v3702_v63 = vld [vmem:[%s4774_s2 + $0xac0] ss:$8 sps:$4 sm:$0xff]  }
 0x4aa   :  { %3495 = vmatprep.subr.bf16.mxu1 %v3874_v0 }
 0x4ad   :  { %3496 = vmatpush3.bf16.msra.mxu1 %v3672_v1  ;;  %v3703_v1 = vld [vmem:[%s4774_s2 + $0xa40] ss:$8 sps:$4 sm:$0xff]  }
 0x4ae   :  { %3497 = vmatprep.subr.bf16.mxu1 %v3874_v0 }
 0x4b1   :  { %3498 = vmatpush3.bf16.msra.mxu1 %v3673_v2  ;;  %v3704_v2 = vld [vmem:[%s4774_s2 + $0xad0] ss:$8 sps:$4 sm:$0xff]  }
 0x4b2   :  { %3499 = vmatprep.subr.bf16.mxu1 %v3874_v0 }
 0x4b5   :  { %3500 = vmatpush3.bf16.msra.mxu1 %v3674_v3  ;;  %v3705_v3 = vld [vmem:[%s4774_s2 + $0xa50] ss:$8 sps:$4 sm:$0xff]  }
 0x4b6   :  { %3501 = vmatprep.subr.bf16.mxu1 %v3874_v0 }
 0x4b9   :  { %3502 = vmatpush3.bf16.msra.mxu1 %v3675_v4  ;;  %v2805_v4 = vld [vmem:[%s4776_s3 + $0x10] sm:$0x3] }
 0x4ba   :  { %3503 = vmatprep.subr.bf16.mxu1 %v3874_v0 }
 0x4bd   :  { %3504 = vmatpush3.bf16.msra.mxu1 %v3676_v5  ;;  %v985_v5 = vrot.slane %v2805_v4, %v3992_v23  ;;  %v3733_v4 = vld [vmem:[%s4774_s2 + $0xc50] ss:$8 sps:$4 sm:$0xff]  }
 0x4be   :  { %3505 = vmatprep.subr.bf16.mxu1 %v3874_v0 }
 0x4c1   :  { %3506 = vmatpush3.bf16.msra.mxu1 %v3677_v16 }
 0x4c2   :  { %3531 = vmatprep.subr.bf16.mxu1 %v3874_v0 }
 0x577   :  { %v720_v8 = vpop.f32.mrb[8].mxu1 }
 0x578   :  { %v721_v10 = vadd.f32 %v720_v8, %v636_v7  ;;  %v3469_v12 = vpop.f32.mrb[9].mxu1 }
 0x579   :  { %v723_v13 = vpop.f32.mrb[10].mxu1 }
 0x57a   :  { %v726_v11 = vadd.f32 %v721_v10, %v4075_v9  ;;  %v3470_v14 = vpop.f32.mrb[11].mxu1  ;;  %v3679_v9 = vld [vmem:[%s4774_s2 + $0x810] ss:$8 sps:$4 sm:$0xff]  }
 0x57c   :  { %v744_v15 = vpack.c.bf16 %v726_v11, %v726_v11 }
 0x57e   :  { %3488 = vmatmul.mubr.bf16.vlgmr.msra.gmra.mrb[12].mxu0 %v744_v15 }
 0x57f   :  { %3527 = vmatprep.mubr.msk.bf16.mxu0 %vm3875_vm0, %v3874_v0  ;;  %3512 = vmatpush3.bf16.msra.mxu0 %v3678_v17 }
 0x580   :  { %3513 = vmatprep.subr.bf16.mxu0 %v3874_v0 }
 0x583   :  { %3514 = vmatpush3.bf16.msra.mxu0 %v3679_v9  ;;  %v3706_v9 = vld [vmem:[%s4774_s2 + $0xae0] ss:$8 sps:$4 sm:$0xff]  }
 0x584   :  { %3515 = vmatprep.subr.bf16.mxu0 %v3874_v0 }
 0x587   :  { %3516 = vmatpush3.bf16.msra.mxu0 %v3680_v28 }
 0x588   :  { %3517 = vmatprep.subr.bf16.mxu0 %v3874_v0 }
 0x58b   :  { %3518 = vmatpush3.bf16.msra.mxu0 %v3681_v29 }
 0x58c   :  { %3519 = vmatprep.subr.bf16.mxu0 %v3874_v0 }
 0x58f   :  { %3520 = vmatpush3.bf16.msra.mxu0 %v3682_v30 }
 0x590   :  { %3521 = vmatprep.subr.bf16.mxu0 %v3874_v0 }
 0x593   :  { %3522 = vmatpush3.bf16.msra.mxu0 %v3683_v31  ;;  %v4366_v31 = vld [vmem:[%s4777_s0] sm:$0xff] }
 0x594   :  { %3523 = vmatprep.subr.bf16.mxu0 %v3874_v0 }
 0x597   :  { %3524 = vmatpush3.bf16.msra.mxu0 %v3684_v32 }
 0x598   :  { %3525 = vmatprep.subr.bf16.mxu0 %v3874_v0 }
 0x59b   :  { %3526 = vmatpush3.bf16.msra.mxu0 %v3685_v33 }
 0x59c   :  { %3258 = vmatprep.subr.bf16.mxu0 %v3694_v55 }
 0x651   :  { %v835_v20 = vpop.f32.mrb[12].mxu0 }
 0x652   :  { %v4232_v21 = vadd.f32 %v835_v20, %v751_v19  ;;  %v3489_v24 = vpop.f32.mrb[13].mxu0  ;;  %v3708_v19 = vld [vmem:[%s4774_s2 + $0xaf0] ss:$8 sps:$4 sm:$0xff]  }
 0x653   :  { %v838_v25 = vpop.f32.mrb[14].mxu0  ;;  %v3709_v20 = vld [vmem:[%s4774_s2 + $0xa70] ss:$8 sps:$4 sm:$0xff]   ;;  %v3710_v24 = vld [vmem:[%s4774_s2 + $0xb00] ss:$8 sps:$4 sm:$0xff]  }
 0x654   :  { %v858_v26 = vpack.c.bf16 %v4232_v21, %v4232_v21  ;;  %v3490_v27 = vpop.f32.mrb[15].mxu0  ;;  %v3711_v25 = vld [vmem:[%s4774_s2 + $0xb10] ss:$8 sps:$4 sm:$0xff]  }
 0x656   :  { %3508 = vmatmul.mubr.bf16.vlgmr.msra.gmra.mrb[12].mxu1 %v858_v26  ;;  %v2831_v26 = vld [vmem:[%s4776_s3 + $0x12] sm:$0x3] }
 0x657   :  { %3547 = vmatprep.mubr.msk.bf16.mxu1 %vm3875_vm0, %v3874_v0  ;;  %3532 = vmatpush3.bf16.msra.mxu1 %v3686_v34  ;;  %v1105_v27 = vrot.slane %v2831_v26, %v3992_v23  ;;  %v3742_v26 = vld [vmem:[%s4774_s2 + $0xd80] ss:$8 sps:$4 sm:$0xff]  }
 0x658   :  { %3533 = vmatprep.subr.bf16.mxu1 %v3874_v0 }
 0x65b   :  { %3534 = vmatpush3.bf16.msra.mxu1 %v3687_v35  ;;  %v1198_v35 = vpack.c.bf16 %v4366_v31, %v4366_v31 }
 0x65c   :  { %3535 = vmatprep.subr.bf16.mxu1 %v3874_v0 }
 0x65f   :  { %3536 = vmatpush3.bf16.msra.mxu1 %v3688_v49 }
 0x660   :  { %3537 = vmatprep.subr.bf16.mxu1 %v3874_v0 }
 0x663   :  { %3538 = vmatpush3.bf16.msra.mxu1 %v3689_v50 }
 0x664   :  { %3539 = vmatprep.subr.bf16.mxu1 %v3874_v0 }
 0x667   :  { %3540 = vmatpush3.bf16.msra.mxu1 %v3690_v51 }
 0x668   :  { %3541 = vmatprep.subr.bf16.mxu1 %v3874_v0 }
 0x66b   :  { %3542 = vmatpush3.bf16.msra.mxu1 %v3691_v52 }
 0x66c   :  { %3543 = vmatprep.subr.bf16.mxu1 %v3874_v0 }
 0x66f   :  { %3544 = vmatpush3.bf16.msra.mxu1 %v3692_v53 }
 0x670   :  { %3545 = vmatprep.subr.bf16.mxu1 %v3874_v0 }
 0x673   :  { %3546 = vmatpush3.bf16.msra.mxu1 %v3693_v54 }
 0x674   :  { %3551 = vmatprep.subr.bf16.mxu1 %v3874_v0 }
 0x729   :  { %v949_v38 = vpop.f32.mrb[12].mxu1 }
 0x72a   :  { %v950_v39 = vadd.f32 %v949_v38, %v865_v37  ;;  %v3509_v40 = vpop.f32.mrb[13].mxu1  ;;  %v3712_v37 = vld [vmem:[%s4774_s2 + $0xb20] ss:$8 sps:$4 sm:$0xff]  }
 0x72b   :  { %v952_v41 = vpop.f32.mrb[14].mxu1  ;;  %v3714_v38 = vld [vmem:[%s4774_s2 + $0xb40] ss:$8 sps:$4 sm:$0xff]  }
 0x72c   :  { %v956_v42 = vmin.f32 %v950_v39, 0.0  ;;  %v3510_v43 = vpop.f32.mrb[15].mxu1  ;;  %vm955_vm5 = vcmp.gt.f32.partialorder %v950_v39, 0.0  ;;  %v3716_v40 = vld [vmem:[%s4774_s2 + $0xb60] ss:$8 sps:$4 sm:$0xff]  }
 0x72d   :  { %v3717_v41 = vld [vmem:[%s4774_s2 + $0xb70] ss:$8 sps:$4 sm:$0xff]   ;;  %v3720_v43 = vld [vmem:[%s4774_s2 + $0xc04] ss:$8 sps:$4 sm:$0xff]  }
 0x72e   :  { %v957_v44 = vmul.f32 1.442695, %v956_v42  ;;  %v3718_v42 = vld [vmem:[%s4774_s2 + $0xc00] ss:$8 sps:$4 sm:$0xff]  }
 0x730   :  { %3846 = vpow2.f32 %v957_v44  ;;  %v3723_v44 = vld [vmem:[%s4774_s2 + $0xc14] ss:$8 sps:$4 sm:$0xff]  }
 0x73a   :  { %v3847_v45 = vpop.eup %3846 }
 0x73b   :  { %v2788_v46 = vadd.f32 -1.0, %v3847_v45  ;;  %v3721_v45 = vld [vmem:[%s4774_s2 + $0xc10] ss:$8 sps:$4 sm:$0xff]  }
 0x73d   :  { %v960_v47 = vsel %vm955_vm5, %v950_v39, %v2788_v46  ;;  %v3715_v39 = vld [vmem:[%s4774_s2 + $0xb50] ss:$8 sps:$4 sm:$0xff]   ;;  %v3726_v46 = vld [vmem:[%s4774_s2 + $0xc24] ss:$8 sps:$4 sm:$0xff]  }
 0x73e   :  { %v978_v48 = vpack.c.bf16 %v960_v47, %v960_v47  ;;  %v3724_v47 = vld [vmem:[%s4774_s2 + $0xc20] ss:$8 sps:$4 sm:$0xff]  }
 0x740   :  { %3528 = vmatmul.mubr.bf16.vlgmr.msra.gmra.mrb[16].mxu0 %v978_v48  ;;  %v2872_v48 = vld [vmem:[%s4776_s3 + $0x14] sm:$0x3] }
 0x741   :  { %3259 = vmatpush3.bf16.msra.mxu0 %v3695_v56  ;;  %v1238_v50 = vrot.slane %v2872_v48, %v3992_v23 }
 0x742   :  { %3260 = vmatprep.subr.bf16.mxu0 %v3696_v57 }
 0x745   :  { %3261 = vmatpush3.bf16.msra.mxu0 %v3697_v58 }
 0x746   :  { %3262 = vmatprep.subr.bf16.mxu0 %v3698_v59 }
 0x749   :  { %3263 = vmatpush3.bf16.msra.mxu0 %v3699_v60 }
 0x74a   :  { %3264 = vmatprep.subr.bf16.mxu0 %v3700_v61 }
 0x74d   :  { %3265 = vmatpush3.bf16.msra.mxu0 %v3701_v62  ;;  %v3729_v62 = vld [vmem:[%s4774_s2 + $0xc34] ss:$8 sps:$4 sm:$0xff]  }
 0x74e   :  { %3266 = vmatprep.subr.bf16.mxu0 %v3702_v63  ;;  %v3727_v63 = vld [vmem:[%s4774_s2 + $0xc30] ss:$8 sps:$4 sm:$0xff]  }
 0x751   :  { %3267 = vmatpush3.bf16.msra.mxu0 %v3703_v1  ;;  %v3732_v1 = vld [vmem:[%s4774_s2 + $0xc44] ss:$8 sps:$4 sm:$0xff]  }
 0x752   :  { %3268 = vmatprep.subr.bf16.mxu0 %v3704_v2  ;;  %v3730_v2 = vld [vmem:[%s4774_s2 + $0xc40] ss:$8 sps:$4 sm:$0xff]  }
 0x755   :  { %3269 = vmatpush3.bf16.msra.mxu0 %v3705_v3  ;;  %v3735_v3 = vld [vmem:[%s4774_s2 + $0xc54] ss:$8 sps:$4 sm:$0xff]  }
 0x756   :  { %3270 = vmatprep.subr.bf16.mxu0 %v3706_v9 }
 0x759   :  { %3271 = vmatpush3.bf16.msra.mxu0 %v3707_v18 }
 0x75a   :  { %3272 = vmatprep.subr.bf16.mxu0 %v3708_v19 }
 0x75d   :  { %3273 = vmatpush3.bf16.msra.mxu0 %v3709_v20 }
 0x75e   :  { %1613 = vmatprep.subr.bf16.mxu0 %v3720_v43  ;;  %v3758_v43 = vld [vmem:[%s4774_s2 + $0xe00] ss:$8 sps:$4 sm:$0xff]  }
 0x813   :  { %v1069_v6 = vpop.f32.mrb[16].mxu0 }
 0x814   :  { %v1070_v7 = vadd.f32 %v1069_v6, %v985_v5  ;;  %v3529_v8 = vpop.f32.mrb[17].mxu0  ;;  %v3738_v5 = vld [vmem:[%s4774_s2 + $0xc64] ss:$8 sps:$4 sm:$0xff]   ;;  %v3736_v6 = vld [vmem:[%s4774_s2 + $0xc60] ss:$8 sps:$4 sm:$0xff]  }
 0x815   :  { %v1072_v10 = vpop.f32.mrb[18].mxu0  ;;  %v3739_v8 = vld [vmem:[%s4774_s2 + $0xc70] ss:$8 sps:$4 sm:$0xff]  }
 0x816   :  { %v1076_v12 = vmin.f32 %v1070_v7, 0.0  ;;  %v3530_v13 = vpop.f32.mrb[19].mxu0  ;;  %vm1075_vm6 = vcmp.gt.f32.partialorder %v1070_v7, 0.0  ;;  %v3876_v10 = vmov 0  }
 0x818   :  { %v1077_v11 = vmul.f32 1.442695, %v1076_v12  ;;  %v2906_v12 = vld [vmem:[%s4776_s3 + $0x16] sm:$0x3] }
 0x819   :  { %v1406_v13 = vrot.slane %v2906_v12, %v3992_v23  ;;  %v3772_v12 = vld [vmem:[%s4774_s2 + $0xf20] ss:$8 sps:$4 sm:$0xff]  }
 0x81a   :  { %3848 = vpow2.f32 %v1077_v11 }
 0x824   :  { %v3849_v14 = vpop.eup %3848 }
 0x825   :  { %v2814_v15 = vadd.f32 -1.0, %v3849_v14 }
 0x827   :  { %v1080_v16 = vsel %vm1075_vm6, %v1070_v7, %v2814_v15  ;;  %v3741_v7 = vld [vmem:[%s4774_s2 + $0xc74] ss:$8 sps:$4 sm:$0xff]  }
 0x828   :  { %v1098_v17 = vpack.c.bf16 %v1080_v16, %v1080_v16 }
 0x82a   :  { %3548 = vmatmul.mubr.bf16.vlgmr.msra.gmra.mrb[16].mxu1 %v1098_v17 }
 0x82b   :  { %3567 = vmatprep.mubr.msk.bf16.mxu1 %vm3875_vm0, %v3874_v0  ;;  %3552 = vmatpush3.bf16.msra.mxu1 %v3710_v24 }
 0x82c   :  { %3553 = vmatprep.subr.bf16.mxu1 %v3874_v0 }
 0x82f   :  { %3554 = vmatpush3.bf16.msra.mxu1 %v3711_v25 }
 0x830   :  { %3555 = vmatprep.subr.bf16.mxu1 %v3874_v0 }
 0x833   :  { %3556 = vmatpush3.bf16.msra.mxu1 %v3712_v37  ;;  %v3751_v37 = vld [vmem:[%s4774_s2 + $0xd40] ss:$8 sps:$4 sm:$0xff]  }
 0x834   :  { %3557 = vmatprep.subr.bf16.mxu1 %v3874_v0 }
 0x8fd   :  { %v1189_v28 = vpop.f32.mrb[16].mxu1 }
 0x8fe   :  { %v1190_v29 = vadd.f32 %v1189_v28, %v1105_v27  ;;  %v3549_v30 = vpop.f32.mrb[17].mxu1  ;;  %v3743_v27 = vld [vmem:[%s4774_s2 + $0xd00] ss:$8 sps:$4 sm:$0xff]   ;;  %v3744_v28 = vld [vmem:[%s4774_s2 + $0xd90] ss:$8 sps:$4 sm:$0xff]  }
 0x8ff   :  { %v1192_v32 = vpop.f32.mrb[18].mxu1  ;;  %v3746_v30 = vld [vmem:[%s4774_s2 + $0xda0] ss:$8 sps:$4 sm:$0xff]  }
 0x900   :  { %v1195_v33 = vadd.f32 %v1190_v29, %v4232_v21  ;;  %v3550_v34 = vpop.f32.mrb[19].mxu1  ;;  %v3713_v21 = vld [vmem:[%s4774_s2 + $0xb30] ss:$8 sps:$4 sm:$0xff]   ;;  %v3747_v32 = vld [vmem:[%s4774_s2 + $0xd20] ss:$8 sps:$4 sm:$0xff]  }
 0x901   :  { %3558 = vmatpush3.bf16.msra.mxu1 %v3713_v21  ;;  %v3745_v29 = vld [vmem:[%s4774_s2 + $0xd10] ss:$8 sps:$4 sm:$0xff]  }
 0x902   :  { %v4371_v36 = vpack.c.bf16 %v1195_v33, %v1195_v33  ;;  %3559 = vmatprep.subr.bf16.mxu1 %v3874_v0  ;;  %v3748_v33 = vld [vmem:[%s4774_s2 + $0xdb0] ss:$8 sps:$4 sm:$0xff]  }
 0x903   :  { %v3749_v34 = vld [vmem:[%s4774_s2 + $0xd30] ss:$8 sps:$4 sm:$0xff]  }
 0x904   :  { %1368 = vmatprep.mubr.bf16.mxu0 %v4371_v36  ;;  %v3752_v21 = vld [vmem:[%s4774_s2 + $0xdd0] ss:$8 sps:$4 sm:$0xff]  }
 0x905   :  { %1369 = vmatmul.mubr.bf16.vlgmr.msra.gmra.mrb[20].mxu0 %v1198_v35  ;;  %3560 = vmatpush3.bf16.msra.mxu1 %v3714_v38  ;;  %v3750_v35 = vld [vmem:[%s4774_s2 + $0xdc0] ss:$8 sps:$4 sm:$0xff]   ;;  %v3753_v38 = vld [vmem:[%s4774_s2 + $0xd50] ss:$8 sps:$4 sm:$0xff]  }
 0x906   :  { %3561 = vmatprep.subr.bf16.mxu1 %v3874_v0  ;;  %1614 = vmatpush1.bf16.msra.mxu0 %v3718_v42  ;;  %v3757_v42 = vld [vmem:[%s4774_s2 + $0xd70] ss:$8 sps:$4 sm:$0xff]  }
 0x907   :  { %1615 = vmatprep.subr.bf16.mxu0 %v3723_v44  ;;  %1645 = vmatprep.mubr.bf16.mxu0 %v3876_v10  ;;  %v3759_v44 = vld [vmem:[%s4774_s2 + $0xe10] ss:$8 sps:$4 sm:$0xff]  }
 0x909   :  { %3562 = vmatpush3.bf16.msra.mxu1 %v3715_v39  ;;  %v3754_v39 = vld [vmem:[%s4774_s2 + $0xde0] ss:$8 sps:$4 sm:$0xff]  }
 0x90a   :  { %3563 = vmatprep.subr.bf16.mxu1 %v3874_v0  ;;  %1616 = vmatpush1.bf16.msra.mxu0 %v3721_v45  ;;  %v4515_v45 = vsub.s32 1, %v3989_v22 }
 0x90b   :  { %1617 = vmatprep.subr.bf16.mxu0 %v3726_v46  ;;  %v2932_v46 = vld [vmem:[%s4776_s3 + $0x18] sm:$0x3] }
 0x90c   :  { %v1526_v22 = vrot.slane %v2932_v46, %v3992_v23 }
 0x90d   :  { %3564 = vmatpush3.bf16.msra.mxu1 %v3716_v40  ;;  %v3755_v40 = vld [vmem:[%s4774_s2 + $0xd60] ss:$8 sps:$4 sm:$0xff]  }
 0x90e   :  { %3565 = vmatprep.subr.bf16.mxu1 %v3874_v0  ;;  %1618 = vmatpush1.bf16.msra.mxu0 %v3724_v47  ;;  %v1530_v47 = vrot.slane %v2932_v46, %v4515_v45 }
 0x90f   :  { %1619 = vmatprep.subr.bf16.mxu0 %v3729_v62  ;;  %v3760_v62 = vld [vmem:[%s4774_s2 + $0xe20] ss:$8 sps:$4 sm:$0xff]  }
 0x911   :  { %3566 = vmatpush3.bf16.msra.mxu1 %v3717_v41  ;;  %v3756_v41 = vld [vmem:[%s4774_s2 + $0xdf0] ss:$8 sps:$4 sm:$0xff]  }
 0x912   :  { %1620 = vmatpush1.bf16.msra.mxu0 %v3727_v63  ;;  %3289 = vmatprep.subr.bf16.mxu1 %v3742_v26  ;;  %v3761_v63 = vld [vmem:[%s4774_s2 + $0xe30] ss:$8 sps:$4 sm:$0xff]  }
 0x913   :  { %1621 = vmatprep.subr.bf16.mxu0 %v3732_v1  ;;  %v3763_v1 = vld [vmem:[%s4774_s2 + $0xe50] ss:$8 sps:$4 sm:$0xff]  }
 0x916   :  { %1622 = vmatpush1.bf16.msra.mxu0 %v3730_v2  ;;  %v3764_v2 = vld [vmem:[%s4774_s2 + $0xe60] ss:$8 sps:$4 sm:$0xff]  }
 0x917   :  { %1623 = vmatprep.subr.bf16.mxu0 %v3735_v3  ;;  %v3765_v3 = vld [vmem:[%s4774_s2 + $0xe70] ss:$8 sps:$4 sm:$0xff]  }
 0x91a   :  { %1624 = vmatpush1.bf16.msra.mxu0 %v3733_v4  ;;  %v3766_v4 = vld [vmem:[%s4774_s2 + $0xf00] ss:$8 sps:$4 sm:$0xff]  }
 0x91b   :  { %1625 = vmatprep.subr.bf16.mxu0 %v3738_v5  ;;  %v3768_v5 = vld [vmem:[%s4774_s2 + $0xf04] ss:$8 sps:$4 sm:$0xff]  }
 0x91e   :  { %1626 = vmatpush1.bf16.msra.mxu0 %v3736_v6  ;;  %v3771_v6 = vld [vmem:[%s4774_s2 + $0xf14] ss:$8 sps:$4 sm:$0xff]  }
 0x91f   :  { %1627 = vmatprep.subr.bf16.mxu0 %v3741_v7  ;;  %v3769_v7 = vld [vmem:[%s4774_s2 + $0xf10] ss:$8 sps:$4 sm:$0xff]  }
 0x922   :  { %1628 = vmatpush1.bf16.msra.mxu0 %v3739_v8  ;;  %v3774_v8 = vld [vmem:[%s4774_s2 + $0xf24] ss:$8 sps:$4 sm:$0xff]  }
 0x923   :  { %3571 = vmatprep.subr.bf16.mxu0 %v3874_v0 }
 0x9d8   :  { %v3274_v49 = vpop.f32.mrb[20].mxu0 }
 0x9d9   :  { %v3275_v51 = vpop.f32.mrb[21].mxu0 }
 0x9da   :  { %v3276_v52 = vadd.f32 %v3275_v51, %v3274_v49  ;;  %v3277_v53 = vpop.f32.mrb[22].mxu0 }
 0x9db   :  { %v3278_v54 = vpop.f32.mrb[23].mxu0 }
 0x9dc   :  { %v1371_v55 = vadd.f32 %v3276_v52, %v1238_v50 }
 0x9de   :  { %v1377_v56 = vmin.f32 %v1371_v55, 0.0  ;;  %vm1376_vm7 = vcmp.gt.f32.partialorder %v1371_v55, 0.0 }
 0x9e0   :  { %v1378_v57 = vmul.f32 1.442695, %v1377_v56 }
 0x9e2   :  { %3850 = vpow2.f32 %v1378_v57 }
 0x9ec   :  { %v3851_v58 = vpop.eup %3850 }
 0x9ed   :  { %v2889_v59 = vadd.f32 -1.0, %v3851_v58 }
 0x9ef   :  { %v1381_v60 = vsel %vm1376_vm7, %v1371_v55, %v2889_v59 }
 0x9f0   :  { %v1399_v61 = vpack.c.bf16 %v1381_v60, %v1381_v60 }
 0x9f2   :  { %3568 = vmatmul.mubr.bf16.vlgmr.msra.gmra.mrb[20].mxu1 %v1399_v61 }
 0x9f3   :  { %1832 = vmatprep.mubr.bf16.mxu1 %v4371_v36  ;;  %3290 = vmatpush3.bf16.msra.mxu1 %v3743_v27 }
 0x9f4   :  { %3291 = vmatprep.subr.bf16.mxu1 %v3744_v28  ;;  %v3777_v28 = vld [vmem:[%s4774_s2 + $0xf34] ss:$8 sps:$4 sm:$0xff]  }
 0x9f7   :  { %3292 = vmatpush3.bf16.msra.mxu1 %v3745_v29  ;;  %v3775_v29 = vld [vmem:[%s4774_s2 + $0xf30] ss:$8 sps:$4 sm:$0xff]  }
 0x9f8   :  { %3293 = vmatprep.subr.bf16.mxu1 %v3746_v30  ;;  %v3780_v30 = vld [vmem:[%s4774_s2 + $0xf44] ss:$8 sps:$4 sm:$0xff]  }
 0x9fb   :  { %3294 = vmatpush3.bf16.msra.mxu1 %v3747_v32  ;;  %v3778_v32 = vld [vmem:[%s4774_s2 + $0xf40] ss:$8 sps:$4 sm:$0xff]  }
 0x9fc   :  { %3295 = vmatprep.subr.bf16.mxu1 %v3748_v33  ;;  %v3781_v33 = vld [vmem:[%s4774_s2 + $0xf50] ss:$8 sps:$4 sm:$0xff]  }
 0x9ff   :  { %3296 = vmatpush3.bf16.msra.mxu1 %v3749_v34  ;;  %v3786_v34 = vld [vmem:[%s4774_s2 + $0xf64] ss:$8 sps:$4 sm:$0xff]  }
 0xa00   :  { %3297 = vmatprep.subr.bf16.mxu1 %v3750_v35  ;;  %v3784_v35 = vld [vmem:[%s4774_s2 + $0xf60] ss:$8 sps:$4 sm:$0xff]  }
 0xa03   :  { %3298 = vmatpush3.bf16.msra.mxu1 %v3751_v37  ;;  %v3789_v37 = vld [vmem:[%s4774_s2 + $0xf74] ss:$8 sps:$4 sm:$0xff]  }
 0xa04   :  { %3299 = vmatprep.subr.bf16.mxu1 %v3752_v21  ;;  %v3787_v21 = vld [vmem:[%s4774_s2 + $0xf70] ss:$8 sps:$4 sm:$0xff]  }
 0xa07   :  { %3300 = vmatpush3.bf16.msra.mxu1 %v3753_v38  ;;  %v3015_v38 = vld [vmem:[%s4776_s3 + $0x1c] sm:$0x3] }
 0xa08   :  { %3301 = vmatprep.subr.bf16.mxu1 %v3754_v39  ;;  %v1870_v39 = vrot.slane %v3015_v38, %v3992_v23 }
 0xa0b   :  { %3302 = vmatpush3.bf16.msra.mxu1 %v3755_v40 }
 0xa0c   :  { %3303 = vmatprep.subr.bf16.mxu1 %v3756_v41 }
 0xa0f   :  { %3304 = vmatpush3.bf16.msra.mxu1 %v3757_v42 }
 0xa10   :  { %2077 = vmatprep.subr.bf16.mxu1 %v3768_v5  ;;  %v3806_v5 = vld [vmem:[%s4774_s2 + $0x1100] ss:$8 sps:$4 sm:$0xff]  }
 0xac5   :  { %v1490_v11 = vpop.f32.mrb[20].mxu1 }
 0xac6   :  { %v1491_v14 = vadd.f32 %v1490_v11, %v1406_v13  ;;  %v3569_v15 = vpop.f32.mrb[21].mxu1  ;;  %v2981_v13 = vld [vmem:[%s4776_s3 + $0x1a] sm:$0x3] }
 0xac7   :  { %v1493_v16 = vpop.f32.mrb[22].mxu1 }
 0xac8   :  { %v1497_v17 = vmin.f32 %v1491_v14, 0.0  ;;  %v3570_v9 = vpop.f32.mrb[23].mxu1  ;;  %vm1496_vm8 = vcmp.gt.f32.partialorder %v1491_v14, 0.0 }
 0xaca   :  { %v1498_v18 = vmul.f32 1.442695, %v1497_v17 }
 0xacc   :  { %3852 = vpow2.f32 %v1498_v18 }
 0xad6   :  { %v3853_v19 = vpop.eup %3852 }
 0xad7   :  { %v2915_v20 = vadd.f32 -1.0, %v3853_v19 }
 0xad9   :  { %v1501_v24 = vsel %vm1496_vm8, %v1491_v14, %v2915_v20  ;;  %v1702_v14 = vrot.slane %v2981_v13, %v3992_v23 }
 0xada   :  { %v1502_v25 = vpack.c.bf16 %v1501_v24, %v1501_v24 }
 0xadc   :  { %1646 = vmatmul.mubr.bf16.vlgmr.msra.gmra.mrb[24].mxu0 %v1502_v25 }
 0xadd   :  { %3587 = vmatprep.mubr.msk.bf16.mxu0 %vm3875_vm0, %v3874_v0  ;;  %3572 = vmatpush3.bf16.msra.mxu0 %v3758_v43 }
 0xade   :  { %3573 = vmatprep.subr.bf16.mxu0 %v3874_v0 }
 0xae1   :  { %3574 = vmatpush3.bf16.msra.mxu0 %v3759_v44 }
 0xae2   :  { %3575 = vmatprep.subr.bf16.mxu0 %v3874_v0 }
 0xae5   :  { %3576 = vmatpush3.bf16.msra.mxu0 %v3760_v62  ;;  %v3799_v62 = vld [vmem:[%s4774_s2 + $0x1040] ss:$8 sps:$4 sm:$0xff]  }
 0xae6   :  { %3577 = vmatprep.subr.bf16.mxu0 %v3874_v0 }
 0xae9   :  { %3578 = vmatpush3.bf16.msra.mxu0 %v3761_v63  ;;  %v3800_v63 = vld [vmem:[%s4774_s2 + $0x10d0] ss:$8 sps:$4 sm:$0xff]  }
 0xaea   :  { %3579 = vmatprep.subr.bf16.mxu0 %v3874_v0 }
 0xbaf   :  { %v1647_v48 = vpop.f32.mrb[24].mxu0 }
 0xbb0   :  { %v1649_v49 = vpop.f32.mrb[25].mxu0  ;;  %v1648_v58 = vadd.f32 %v1647_v48, %v1526_v22  ;;  %v3794_v22 = vld [vmem:[%s4774_s2 + $0x10a0] ss:$8 sps:$4 sm:$0xff]  }
 0xbb1   :  { %v1650_v50 = vadd.f32 %v1649_v49, %v1530_v47  ;;  %v1651_v51 = vpop.f32.mrb[26].mxu0 }
 0xbb2   :  { %v1652_v52 = vpop.f32.mrb[27].mxu0 }
 0xbb3   :  { %v1654_v53 = vmul.f32 0.33333334, %v1650_v50  ;;  %v3790_v52 = vld [vmem:[%s4774_s2 + $0x1080] ss:$8 sps:$4 sm:$0xff]  }
 0xbb5   :  { %3854 = vtanh.f32 %v1654_v53  ;;  %v3791_v53 = vld [vmem:[%s4774_s2 + $0x1000] ss:$8 sps:$4 sm:$0xff]  }
 0xbbf   :  { %v3855_v54 = vpop.eup %3854 }
 0xbc0   :  { %v4521_v55 = vmul.f32 3.0, %v3855_v54  ;;  %v3792_v54 = vld [vmem:[%s4774_s2 + $0x1090] ss:$8 sps:$4 sm:$0xff]  }
 0xbc2   :  { %v1657_v56 = vmul.f32 1.442695, %v4521_v55 }
 0xbc4   :  { %3856 = vpow2.f32 %v1657_v56  ;;  %v3793_v56 = vld [vmem:[%s4774_s2 + $0x1010] ss:$8 sps:$4 sm:$0xff]  }
 0xbce   :  { %v3857_v57 = vpop.eup %3856 }
 0xbcf   :  { %v1659_v59 = vmul.f32 %v3857_v57, %v4366_v31  ;;  %v3762_v31 = vld [vmem:[%s4774_s2 + $0xe40] ss:$8 sps:$4 sm:$0xff]  }
 0xbd0   :  { %3580 = vmatpush3.bf16.msra.mxu0 %v3762_v31  ;;  %v3795_v57 = vld [vmem:[%s4774_s2 + $0x1020] ss:$8 sps:$4 sm:$0xff]   ;;  %v3801_v31 = vld [vmem:[%s4774_s2 + $0x1050] ss:$8 sps:$4 sm:$0xff]  }
 0xbd1   :  { %v4526_v60 = vadd.f32 %v1659_v59, %v1648_v58  ;;  %3581 = vmatprep.subr.bf16.mxu0 %v3874_v0  ;;  %v3796_v58 = vld [vmem:[%s4774_s2 + $0x10b0] ss:$8 sps:$4 sm:$0xff]  }
 0xbd2   :  { %v3797_v59 = vld [vmem:[%s4774_s2 + $0x1030] ss:$8 sps:$4 sm:$0xff]  }
 0xbd3   :  { %v1662_v61 = vpack.c.bf16 %v4526_v60, %v4526_v60 }
 0xbd4   :  { %3582 = vmatpush3.bf16.msra.mxu0 %v3763_v1  ;;  %v3802_v1 = vld [vmem:[%s4774_s2 + $0x10e0] ss:$8 sps:$4 sm:$0xff]  }
 0xbd5   :  { %1833 = vmatmul.mubr.bf16.vlgmr.msra.gmra.mrb[24].mxu1 %v1662_v61  ;;  %3583 = vmatprep.subr.bf16.mxu0 %v3874_v0  ;;  %v3798_v61 = vld [vmem:[%s4774_s2 + $0x10c0] ss:$8 sps:$4 sm:$0xff]  }
 0xbd6   :  { %2109 = vmatprep.mubr.bf16.mxu1 %v3876_v10  ;;  %2078 = vmatpush1.bf16.msra.mxu1 %v3766_v4  ;;  %v3805_v4 = vld [vmem:[%s4774_s2 + $0x1070] ss:$8 sps:$4 sm:$0xff]  }
 0xbd7   :  { %2079 = vmatprep.subr.bf16.mxu1 %v3771_v6  ;;  %v3807_v6 = vld [vmem:[%s4774_s2 + $0x1110] ss:$8 sps:$4 sm:$0xff]  }
 0xbd8   :  { %3584 = vmatpush3.bf16.msra.mxu0 %v3764_v2  ;;  %v3803_v2 = vld [vmem:[%s4774_s2 + $0x1060] ss:$8 sps:$4 sm:$0xff]  }
 0xbd9   :  { %3585 = vmatprep.subr.bf16.mxu0 %v3874_v0 }
 0xbda   :  { %2080 = vmatpush1.bf16.msra.mxu1 %v3769_v7  ;;  %v3041_v7 = vld [vmem:[%s4776_s3 + $0x1e] sm:$0x3] }
 0xbdb   :  { %2081 = vmatprep.subr.bf16.mxu1 %v3774_v8  ;;  %v1994_v8 = vrot.slane %v3041_v7, %v4515_v45 }
 0xbdc   :  { %3586 = vmatpush3.bf16.msra.mxu0 %v3765_v3  ;;  %v3804_v3 = vld [vmem:[%s4774_s2 + $0x10f0] ss:$8 sps:$4 sm:$0xff]  }
 0xbdd   :  { %3320 = vmatprep.subr.bf16.mxu0 %v3790_v52  ;;  %v3825_v52 = vld [vmem:[%s4774_s2 + $0x1234] ss:$8 sps:$4 sm:$0xff]  }
 0xbde   :  { %2082 = vmatpush1.bf16.msra.mxu1 %v3772_v12 }
 0xbdf   :  { %2083 = vmatprep.subr.bf16.mxu1 %v3777_v28  ;;  %v3808_v28 = vld [vmem:[%s4774_s2 + $0x1120] ss:$8 sps:$4 sm:$0xff]  }
 0xbe2   :  { %2084 = vmatpush1.bf16.msra.mxu1 %v3775_v29  ;;  %v3809_v29 = vld [vmem:[%s4774_s2 + $0x1130] ss:$8 sps:$4 sm:$0xff]  }
 0xbe3   :  { %2085 = vmatprep.subr.bf16.mxu1 %v3780_v30  ;;  %v3812_v30 = vld [vmem:[%s4774_s2 + $0x1160] ss:$8 sps:$4 sm:$0xff]  }
 0xbe6   :  { %2086 = vmatpush1.bf16.msra.mxu1 %v3778_v32  ;;  %v3813_v32 = vld [vmem:[%s4774_s2 + $0x1170] ss:$8 sps:$4 sm:$0xff]  }
 0xca8   :  { %v3305_v11 = vpop.f32.mrb[24].mxu1 }
 0xca9   :  { %v3306_v15 = vpop.f32.mrb[25].mxu1 }
 0xcaa   :  { %v3307_v16 = vadd.f32 %v3306_v15, %v3305_v11  ;;  %v3308_v17 = vpop.f32.mrb[26].mxu1 }
 0xcab   :  { %v3309_v9 = vpop.f32.mrb[27].mxu1 }
 0xcac   :  { %v1835_v18 = vadd.f32 %v3307_v16, %v1702_v14 }
 0xcae   :  { %v1841_v19 = vmin.f32 %v1835_v18, 0.0  ;;  %vm1840_vm9 = vcmp.gt.f32.partialorder %v1835_v18, 0.0 }
 0xcb0   :  { %v1842_v20 = vmul.f32 1.442695, %v1841_v19  ;;  %v1990_v19 = vrot.slane %v3041_v7, %v3992_v23 }
 0xcb2   :  { %3858 = vpow2.f32 %v1842_v20 }
 0xcbc   :  { %v3859_v24 = vpop.eup %3858 }
 0xcbd   :  { %v2998_v25 = vadd.f32 -1.0, %v3859_v24 }
 0xcbf   :  { %v1845_v26 = vsel %vm1840_vm9, %v1835_v18, %v2998_v25 }
 0xcc0   :  { %v1863_v27 = vpack.c.bf16 %v1845_v26, %v1845_v26 }
 0xcc2   :  { %3588 = vmatmul.mubr.bf16.vlgmr.msra.gmra.mrb[28].mxu0 %v1863_v27 }
 0xcc3   :  { %2296 = vmatprep.mubr.bf16.mxu0 %v4371_v36  ;;  %v3783_v36 = vld [vmem:[%s4774_s2 + $0xf54] ss:$8 sps:$4 sm:$0xff]   ;;  %3321 = vmatpush3.bf16.msra.mxu0 %v3791_v53  ;;  %v3823_v53 = vld [vmem:[%s4774_s2 + $0x1230] ss:$8 sps:$4 sm:$0xff]  }
 0xcc4   :  { %2087 = vmatprep.subr.bf16.mxu1 %v3783_v36  ;;  %3322 = vmatprep.subr.bf16.mxu0 %v3792_v54  ;;  %v3814_v36 = vld [vmem:[%s4774_s2 + $0x1200] ss:$8 sps:$4 sm:$0xff]   ;;  %v3828_v54 = vld [vmem:[%s4774_s2 + $0x1244] ss:$8 sps:$4 sm:$0xff]  }
 0xcc5   :  { %2088 = vmatpush1.bf16.msra.mxu1 %v3781_v33  ;;  %v3816_v33 = vld [vmem:[%s4774_s2 + $0x1204] ss:$8 sps:$4 sm:$0xff]  }
 0xcc6   :  { %2089 = vmatprep.subr.bf16.mxu1 %v3786_v34  ;;  %v3819_v34 = vld [vmem:[%s4774_s2 + $0x1214] ss:$8 sps:$4 sm:$0xff]  }
 0xcc7   :  { %3323 = vmatpush3.bf16.msra.mxu0 %v3793_v56  ;;  %v3826_v56 = vld [vmem:[%s4774_s2 + $0x1240] ss:$8 sps:$4 sm:$0xff]  }
 0xcc8   :  { %3324 = vmatprep.subr.bf16.mxu0 %v3794_v22  ;;  %v3831_v22 = vld [vmem:[%s4774_s2 + $0x1254] ss:$8 sps:$4 sm:$0xff]  }
 0xcc9   :  { %2090 = vmatpush1.bf16.msra.mxu1 %v3784_v35  ;;  %v3822_v35 = vld [vmem:[%s4774_s2 + $0x1224] ss:$8 sps:$4 sm:$0xff]  }
 0xcca   :  { %2091 = vmatprep.subr.bf16.mxu1 %v3789_v37  ;;  %v3820_v37 = vld [vmem:[%s4774_s2 + $0x1220] ss:$8 sps:$4 sm:$0xff]  }
 0xccb   :  { %3325 = vmatpush3.bf16.msra.mxu0 %v3795_v57  ;;  %v3829_v57 = vld [vmem:[%s4774_s2 + $0x1250] ss:$8 sps:$4 sm:$0xff]  }
 0xccc   :  { %3326 = vmatprep.subr.bf16.mxu0 %v3796_v58  ;;  %v3834_v58 = vld [vmem:[%s4774_s2 + $0x1264] ss:$8 sps:$4 sm:$0xff]  }
 0xccd   :  { %2092 = vmatpush1.bf16.msra.mxu1 %v3787_v21  ;;  %v3090_v21 = vld [vmem:[%s4776_s3 + $0x20] sm:$0x3] }
 0xcce   :  { %3591 = vmatprep.subr.bf16.mxu1 %v3874_v0 }
 0xccf   :  { %3327 = vmatpush3.bf16.msra.mxu0 %v3797_v59  ;;  %v3832_v59 = vld [vmem:[%s4774_s2 + $0x1260] ss:$8 sps:$4 sm:$0xff]  }
 0xcd0   :  { %3328 = vmatprep.subr.bf16.mxu0 %v3798_v61  ;;  %v3837_v61 = vld [vmem:[%s4774_s2 + $0x1274] ss:$8 sps:$4 sm:$0xff]  }
 0xcd3   :  { %3329 = vmatpush3.bf16.msra.mxu0 %v3799_v62  ;;  %v3835_v62 = vld [vmem:[%s4774_s2 + $0x1270] ss:$8 sps:$4 sm:$0xff]  }
 0xcd4   :  { %3330 = vmatprep.subr.bf16.mxu0 %v3800_v63  ;;  %v3124_v63 = vld [vmem:[%s4776_s3 + $0x22] sm:$0x3] }
 0xcd7   :  { %3331 = vmatpush3.bf16.msra.mxu0 %v3801_v31  ;;  %v2334_v31 = vrot.slane %v3124_v63, %v3992_v23 }
 0xcd8   :  { %3332 = vmatprep.subr.bf16.mxu0 %v3802_v1 }
 0xcdb   :  { %3333 = vmatpush3.bf16.msra.mxu0 %v3803_v2 }
 0xcdc   :  { %3334 = vmatprep.subr.bf16.mxu0 %v3804_v3 }
 0xcdf   :  { %3335 = vmatpush3.bf16.msra.mxu0 %v3805_v4 }
 0xce0   :  { %2541 = vmatprep.subr.bf16.mxu0 %v3816_v33 }
 0xd95   :  { %v1954_v40 = vpop.f32.mrb[28].mxu0 }
 0xd96   :  { %v1955_v41 = vadd.f32 %v1954_v40, %v1870_v39  ;;  %v3589_v42 = vpop.f32.mrb[29].mxu0  ;;  %v2166_v39 = vrot.slane %v3090_v21, %v3992_v23 }
 0xd97   :  { %v1957_v43 = vpop.f32.mrb[30].mxu0 }
 0xd98   :  { %v1961_v44 = vmin.f32 %v1955_v41, 0.0  ;;  %v3590_v46 = vpop.f32.mrb[31].mxu0  ;;  %vm1960_vm10 = vcmp.gt.f32.partialorder %v1955_v41, 0.0 }
 0xd9a   :  { %v1962_v47 = vmul.f32 1.442695, %v1961_v44 }
 0xd9c   :  { %3860 = vpow2.f32 %v1962_v47 }
 0xda6   :  { %v3861_v48 = vpop.eup %3860 }
 0xda7   :  { %v3024_v49 = vadd.f32 -1.0, %v3861_v48 }
 0xda9   :  { %v1965_v50 = vsel %vm1960_vm10, %v1955_v41, %v3024_v49 }
 0xdaa   :  { %v1966_v51 = vpack.c.bf16 %v1965_v50, %v1965_v50 }
 0xdac   :  { %2110 = vmatmul.mubr.bf16.vlgmr.msra.gmra.mrb[28].mxu1 %v1966_v51 }
 0xdad   :  { %3607 = vmatprep.mubr.msk.bf16.mxu1 %vm3875_vm0, %v3874_v0  ;;  %3592 = vmatpush3.bf16.msra.mxu1 %v3806_v5 }
 0xdae   :  { %3593 = vmatprep.subr.bf16.mxu1 %v3874_v0 }
 0xdb1   :  { %3594 = vmatpush3.bf16.msra.mxu1 %v3807_v6 }
 0xdb2   :  { %3595 = vmatprep.subr.bf16.mxu1 %v3874_v0 }
 0xdb5   :  { %3596 = vmatpush3.bf16.msra.mxu1 %v3808_v28 }
 0xdb6   :  { %3597 = vmatprep.subr.bf16.mxu1 %v3874_v0 }
 0xdb9   :  { %3598 = vmatpush3.bf16.msra.mxu1 %v3809_v29 }
 0xdba   :  { %3599 = vmatprep.subr.bf16.mxu1 %v3874_v0 }
 0xe7f   :  { %v2111_v12 = vpop.f32.mrb[28].mxu1 }
 0xe80   :  { %v2113_v13 = vpop.f32.mrb[29].mxu1  ;;  %v2112_v24 = vadd.f32 %v2111_v12, %v1990_v19 }
 0xe81   :  { %v2114_v11 = vadd.f32 %v2113_v13, %v1994_v8  ;;  %v2115_v14 = vpop.f32.mrb[30].mxu1 }
 0xe82   :  { %v2116_v15 = vpop.f32.mrb[31].mxu1  ;;  %v3150_v14 = vld [vmem:[%s4776_s3 + $0x24] sm:$0x3] }
 0xe83   :  { %v2118_v16 = vmul.f32 0.33333334, %v2114_v11  ;;  %v2458_v15 = vrot.slane %v3150_v14, %v4515_v45 }
 0xe85   :  { %3862 = vtanh.f32 %v2118_v16 }
 0xe8f   :  { %v3863_v17 = vpop.eup %3862 }
 0xe90   :  { %v4674_v9 = vmul.f32 3.0, %v3863_v17 }
 0xe92   :  { %v2121_v18 = vmul.f32 1.442695, %v4674_v9 }
 0xe94   :  { %3864 = vpow2.f32 %v2121_v18 }
 0xe9e   :  { %v3865_v20 = vpop.eup %3864 }
 0xe9f   :  { %v2123_v25 = vmul.f32 %v3865_v20, %v4526_v60  ;;  %v3810_v60 = vld [vmem:[%s4774_s2 + $0x1140] ss:$8 sps:$4 sm:$0xff]  }
 0xea0   :  { %3600 = vmatpush3.bf16.msra.mxu1 %v3810_v60 }
 0xea1   :  { %v4679_v26 = vadd.f32 %v2123_v25, %v2112_v24  ;;  %3601 = vmatprep.subr.bf16.mxu1 %v3874_v0 }
 0xea3   :  { %v2126_v27 = vpack.c.bf16 %v4679_v26, %v4679_v26 }
 0xea5   :  { %2297 = vmatmul.mubr.bf16.vlgmr.msra.gmra.mrb[32].mxu0 %v2126_v27  ;;  %v2125_v27 = vadd.f32 %v4674_v9, %v4521_v55 }
 0xea6   :  { %2573 = vmatprep.mubr.bf16.mxu0 %v3876_v10  ;;  %v3811_v10 = vld [vmem:[%s4774_s2 + $0x1150] ss:$8 sps:$4 sm:$0xff]   ;;  %2542 = vmatpush1.bf16.msra.mxu0 %v3814_v36 }
 0xea7   :  { %3602 = vmatpush3.bf16.msra.mxu1 %v3811_v10  ;;  %2543 = vmatprep.subr.bf16.mxu0 %v3819_v34  ;;  %v2454_v10 = vrot.slane %v3150_v14, %v3992_v23 }
 0xea8   :  { %3603 = vmatprep.subr.bf16.mxu1 %v3874_v0 }
 0xeab   :  { %3604 = vmatpush3.bf16.msra.mxu1 %v3812_v30 }
 0xeac   :  { %3605 = vmatprep.subr.bf16.mxu1 %v3874_v0  ;;  %v3817_v0 = vld [vmem:[%s4774_s2 + $0x1210] ss:$8 sps:$4 sm:$0xff]  }
 0xead   :  { %2544 = vmatpush1.bf16.msra.mxu0 %v3817_v0 }
 0xeae   :  { %2545 = vmatprep.subr.bf16.mxu0 %v3822_v35 }
 0xeaf   :  { %3606 = vmatpush3.bf16.msra.mxu1 %v3813_v32 }
 0xeb1   :  { %2546 = vmatpush1.bf16.msra.mxu0 %v3820_v37 }
 0xeb2   :  { %2547 = vmatprep.subr.bf16.mxu0 %v3825_v52 }
 0xeb5   :  { %2548 = vmatpush1.bf16.msra.mxu0 %v3823_v53 }
 0xeb6   :  { %2549 = vmatprep.subr.bf16.mxu0 %v3828_v54 }
 0xeb9   :  { %2550 = vmatpush1.bf16.msra.mxu0 %v3826_v56 }
 0xeba   :  { %2551 = vmatprep.subr.bf16.mxu0 %v3831_v22 }
 0xebd   :  { %2552 = vmatpush1.bf16.msra.mxu0 %v3829_v57 }
 0xebe   :  { %2553 = vmatprep.subr.bf16.mxu0 %v3834_v58 }
 0xec1   :  { %2554 = vmatpush1.bf16.msra.mxu0 %v3832_v59 }
 0xec2   :  { %2555 = vmatprep.subr.bf16.mxu0 %v3837_v61 }
 0xec5   :  { %2556 = vmatpush1.bf16.msra.mxu0 %v3835_v62 }
 0xf78   :  { %v3336_v38 = vpop.f32.mrb[32].mxu0 }
 0xf79   :  { %v3337_v40 = vpop.f32.mrb[33].mxu0 }
 0xf7a   :  { %v3338_v41 = vadd.f32 %v3337_v40, %v3336_v38  ;;  %v3339_v42 = vpop.f32.mrb[34].mxu0 }
 0xf7b   :  { %v3340_v43 = vpop.f32.mrb[35].mxu0 }
 0xf7c   :  { %v2299_v44 = vadd.f32 %v3338_v41, %v2166_v39 }
 0xf7e   :  { %v2305_v46 = vmin.f32 %v2299_v44, 0.0  ;;  %vm2304_vm11 = vcmp.gt.f32.partialorder %v2299_v44, 0.0 }
 0xf80   :  { %v2306_v47 = vmul.f32 1.442695, %v2305_v46 }
 0xf82   :  { %3866 = vpow2.f32 %v2306_v47 }
 0xf8c   :  { %v3867_v48 = vpop.eup %3866 }
 0xf8d   :  { %v3107_v49 = vadd.f32 -1.0, %v3867_v48 }
 0xf8f   :  { %v2309_v50 = vsel %vm2304_vm11, %v2299_v44, %v3107_v49 }
 0xf90   :  { %v2327_v51 = vpack.c.bf16 %v2309_v50, %v2309_v50 }
 0xf92   :  { %3608 = vmatmul.mubr.bf16.vlgmr.msra.gmra.mrb[32].mxu1 %v2327_v51 }
0x1065   :  { %v2418_v1 = vpop.f32.mrb[32].mxu1 }
0x1066   :  { %v2419_v2 = vadd.f32 %v2418_v1, %v2334_v31  ;;  %v3609_v3 = vpop.f32.mrb[33].mxu1 }
0x1067   :  { %v2421_v4 = vpop.f32.mrb[34].mxu1 }
0x1068   :  { %v2425_v5 = vmin.f32 %v2419_v2, 0.0  ;;  %v3610_v6 = vpop.f32.mrb[35].mxu1  ;;  %vm2424_vm12 = vcmp.gt.f32.partialorder %v2419_v2, 0.0 }
0x106a   :  { %v2426_v7 = vmul.f32 1.442695, %v2425_v5 }
0x106c   :  { %3868 = vpow2.f32 %v2426_v7 }
0x1076   :  { %v3869_v8 = vpop.eup %3868 }
0x1077   :  { %v3133_v12 = vadd.f32 -1.0, %v3869_v8 }
0x1079   :  { %v2429_v13 = vsel %vm2424_vm12, %v2419_v2, %v3133_v12 }
0x107a   :  { %v2430_v11 = vpack.c.bf16 %v2429_v13, %v2429_v13 }
0x107c   :  { %2574 = vmatmul.mubr.bf16.vlgmr.msra.gmra.mrb[36].mxu0 %v2430_v11 }
0x114f   :  { %v2575_v16 = vpop.f32.mrb[36].mxu0 }
0x1150   :  { %v2577_v17 = vpop.f32.mrb[37].mxu0  ;;  %v2576_v32 = vadd.f32 %v2575_v16, %v2454_v10 }
0x1151   :  { %v2578_v18 = vadd.f32 %v2577_v17, %v2458_v15  ;;  %v2579_v19 = vpop.f32.mrb[38].mxu0 }
0x1152   :  { %v2580_v20 = vpop.f32.mrb[39].mxu0 }
0x1153   :  { %v2582_v24 = vmul.f32 0.33333334, %v2578_v18 }
0x1155   :  { %3870 = vtanh.f32 %v2582_v24 }
0x115f   :  { %v3871_v25 = vpop.eup %3870 }
0x1160   :  { %v2584_v28 = vmul.f32 3.0, %v3871_v25 }
0x1162   :  { %v2585_v29 = vmul.f32 1.442695, %v2584_v28  ;;  %v2589_v60 = vadd.f32 %v2584_v28, %v2125_v27 }
0x1164   :  { %3872 = vpow2.f32 %v2585_v29 }
0x116e   :  { %v3873_v30 = vpop.eup %3872 }
0x116f   :  { %v2587_v45 = vmul.f32 %v3873_v30, %v4679_v26 }
0x1171   :  { %v2588_v36 = vadd.f32 %v2587_v45, %v2576_v32 }
0x1173   :  { %v2590_v33 = vmul.f32 0.5, %v2588_v36 }
0x1175   :  { %v2591_v34 = vmul.f32 %v2590_v33, %v2588_v36 }
0x1177   :  { %v2592_v0 = vsub.f32 %v2589_v60, %v2591_v34 }
0x1179   :  { %2593 = vadd.xlane.f32.xlu0 %v2592_v0 }
0x1206   :  { %v2594_v35 = vpop.xlane.xlu0 %2593 }
0x1207   :  { %v3167_v37 = vadd.f32 -6.4325695, %v2594_v35 }
0x1209   :  { %2596 = vst [vmem:[%s4778_s4] sm:$0xff] %v3167_v37 }

</bundles_post_ra>
